<compile_context>
chip_gen: v5e
topology: v5e:2x2
jax: 0.10.0
libtpu: 0.0.40
codegen_flags: <defaults>
</compile_context>

<pallas_src>
import functools
import math

import jax
import jax.numpy as jnp
from jax.experimental import pallas as pl
from jax.experimental.pallas import tpu as pltpu


# ---------------------------------------------------------------------------
# model config (synthetic ViT; lane-friendly dims: hidden / mlp / padded head
# are multiples of 128 so every store in the kernel is lane-dense).
# ---------------------------------------------------------------------------
CONFIG = dict(
    image_size=32,
    patch_size=8,
    num_channels=3,
    hidden=128,       # lane-aligned feature dim
    num_heads=2,      # head_dim = 64
    mlp_dim=256,      # lane-aligned
    num_layers=2,
    num_classes=10,   # padded to 128 lanes inside the kernel
)
NC_PAD = 128          # lane-padded classifier width
LN_EPS = 1e-12        # HF ViT layer_norm_eps


# ---------------------------------------------------------------------------
# single fused Pallas kernel:
#   grid = (batch, layer); per grid step: one encoder layer for one image.
#   layer 0 additionally does the patch embedding + CLS/pos init;
#   the last layer additionally does final LN + classifier head (CLS row).
# ---------------------------------------------------------------------------
def _vit_kernel(
    patches_ref, patch_w_ref, cls_pos_ref,
    ln1_g_ref, ln1_b_ref, wqkv_ref, bqkv_ref, wo_ref, bo_ref,
    ln2_g_ref, ln2_b_ref, w1_ref, b1_ref, w2_ref, b2_ref,
    lnf_g_ref, lnf_b_ref, head_w_ref, head_b_ref,
    logits_ref,
    h_ref,
    *, num_heads, scale, eps,
):
    layer = pl.program_id(1)
    n_layers = pl.num_programs(1)

    def bf16(x):
        return x.astype(jnp.bfloat16)

    def layer_norm(x, g, b):
        m = jnp.mean(x, axis=-1, keepdims=True)
        v = jnp.mean(jnp.square(x - m), axis=-1, keepdims=True)
        return (x - m) * jax.lax.rsqrt(v + eps) * g + b

    # --- layer 0: patch embedding + CLS token + position embeddings -------
    # patches row 0 is all-zero (the CLS slot); cls_pos already folds the
    # CLS token, position embeddings and the patch-embedding bias.
    @pl.when(layer == 0)
    def _():
        emb = jnp.dot(bf16(patches_ref[0]), patch_w_ref[...],
                      preferred_element_type=jnp.float32)           # (S, D)
        h_ref[...] = emb + cls_pos_ref[0]

    h = h_ref[...]                                                  # (S, D) f32
    D = h.shape[-1]
    Dh = D // num_heads

    # --- attention block: LN -> packed QKV -> per-head softmax(QK^T)V -----
    hn = layer_norm(h, ln1_g_ref[0], ln1_b_ref[0])
    qkv = jnp.dot(bf16(hn), wqkv_ref[0],
                  preferred_element_type=jnp.float32) + bqkv_ref[0]  # (S, 3D)

    wo = wo_ref[0]                                                   # (D, D) bf16
    attn = None
    for hh in range(num_heads):                 # static unroll (small H)
        q = qkv[:, hh * Dh:(hh + 1) * Dh]
        k = qkv[:, D + hh * Dh:D + (hh + 1) * Dh]
        v = qkv[:, 2 * D + hh * Dh:2 * D + (hh + 1) * Dh]
        s = jnp.einsum("qd,kd->qk", bf16(q), bf16(k),
                       preferred_element_type=jnp.float32) * scale
        s = s - jnp.max(s, axis=-1, keepdims=True)
        p = jnp.exp(s)
        inv = pl.reciprocal(jnp.sum(p, axis=-1, keepdims=True), approx=True)
        o = jnp.einsum("qk,kd->qd", bf16(p), bf16(v),
                       preferred_element_type=jnp.float32) * inv     # (S, Dh)
        # per-head output projection, accumulated (avoids lane concatenate)
        proj = jnp.dot(bf16(o), wo[hh * Dh:(hh + 1) * Dh, :],
                       preferred_element_type=jnp.float32)           # (S, D)
        attn = proj if attn is None else attn + proj
    attn = attn + bo_ref[0]
    h = h + attn                                                     # residual

    # --- MLP block: LN -> linear + GELU -> linear -> residual -------------
    hn = layer_norm(h, ln2_g_ref[0], ln2_b_ref[0])
    mid = jnp.dot(bf16(hn), w1_ref[0],
                  preferred_element_type=jnp.float32) + b1_ref[0]
    # TODO(synk): HF ViT uses exact (erf) GELU; tanh approximation used here
    # so the only transcendental is tanh (EUP-native on all TPU generations).
    mid = jax.nn.gelu(mid, approximate=True)
    mlp = jnp.dot(bf16(mid), w2_ref[0],
                  preferred_element_type=jnp.float32) + b2_ref[0]
    h = h + mlp
    h_ref[...] = h

    # --- final LN + classifier head on the CLS token (last layer only) ----
    @pl.when(layer == n_layers - 1)
    def _():
        cls_tok = layer_norm(h[0:1, :], lnf_g_ref[...], lnf_b_ref[...])  # (1, D)
        logits = (jnp.dot(bf16(cls_tok), head_w_ref[...],
                          preferred_element_type=jnp.float32)
                  + head_b_ref[...])                                 # (1, NC_PAD)
        logits_ref[0] = logits.astype(logits_ref.dtype)


# ---------------------------------------------------------------------------
# parameters (deterministic init — no checkpoint loading)
# ---------------------------------------------------------------------------
# TODO(synk): AutoModelForImageClassification.from_pretrained() checkpoint
# loading has no Pallas equivalent; weights below are synthetic.
def init_params(key, cfg):
    P, C, D = cfg["patch_size"], cfg["num_channels"], cfg["hidden"]
    S = (cfg["image_size"] // P) ** 2 + 1  # patches + CLS
    M, NC = cfg["mlp_dim"], cfg["num_classes"]

    def normal(k, shape, scale=0.02):
        return (scale * jax.random.normal(k, shape)).astype(jnp.float32)

    keys = iter(jax.random.split(key, 64))
    params = {
        "patch_w": normal(next(keys), (C * P * P, D)),
        "patch_b": jnp.zeros((D,), jnp.float32),
        "cls_token": normal(next(keys), (1, 1, D)),
        "pos_emb": normal(next(keys), (1, S, D)),
        "ln_f_g": jnp.ones((D,), jnp.float32),
        "ln_f_b": jnp.zeros((D,), jnp.float32),
        "head_w": normal(next(keys), (D, NC)),
        "head_b": jnp.zeros((NC,), jnp.float32),
        "layers": [],
    }
    for _ in range(cfg["num_layers"]):
        layer = {
            "ln1_g": jnp.ones((D,), jnp.float32),
            "ln1_b": jnp.zeros((D,), jnp.float32),
            "wq": normal(next(keys), (D, D)), "bq": jnp.zeros((D,), jnp.float32),
            "wk": normal(next(keys), (D, D)), "bk": jnp.zeros((D,), jnp.float32),
            "wv": normal(next(keys), (D, D)), "bv": jnp.zeros((D,), jnp.float32),
            "wo": normal(next(keys), (D, D)), "bo": jnp.zeros((D,), jnp.float32),
            "ln2_g": jnp.ones((D,), jnp.float32),
            "ln2_b": jnp.zeros((D,), jnp.float32),
            "w1": normal(next(keys), (D, M)), "b1": jnp.zeros((M,), jnp.float32),
            "w2": normal(next(keys), (M, D)), "b2": jnp.zeros((D,), jnp.float32),
        }
        params["layers"].append(layer)
    return params


def pack_params(params, cfg):
    """Stack per-layer weights (leading layer axis), pack QKV, cast matmul
    weights to bf16, fold CLS/pos/patch-bias into one additive table, and
    lane-pad the classifier head to NC_PAD. Runs once, outside the hot path."""
    D, NC = cfg["hidden"], cfg["num_classes"]
    bf16 = jnp.bfloat16
    layers = params["layers"]

    def stack_vec(name):                          # (L, 1, dim) f32
        return jnp.stack([lp[name] for lp in layers])[:, None, :]

    def stack_mat(name):                          # (L, r, c) bf16
        return jnp.stack([lp[name] for lp in layers]).astype(bf16)

    wqkv = jnp.stack(
        [jnp.concatenate([lp["wq"], lp["wk"], lp["wv"]], axis=1)
         for lp in layers]).astype(bf16)                         # (L, D, 3D)
    bqkv = jnp.stack(
        [jnp.concatenate([lp["bq"], lp["bk"], lp["bv"]], axis=0)
         for lp in layers])[:, None, :]                          # (L, 1, 3D)

    # row 0 = cls_token + pos[0]; rows 1.. = pos[s] + patch_b
    cls_pos = params["pos_emb"]
    cls_pos = cls_pos.at[:, 0, :].add(params["cls_token"][0, 0])
    cls_pos = cls_pos.at[:, 1:, :].add(params["patch_b"][None, None, :])

    head_w = jnp.zeros((D, NC_PAD), jnp.float32).at[:, :NC].set(params["head_w"])
    head_b = jnp.zeros((1, NC_PAD), jnp.float32).at[0, :NC].set(params["head_b"])

    return dict(
        patch_w=params["patch_w"].astype(bf16),
        cls_pos=cls_pos,
        ln1_g=stack_vec("ln1_g"), ln1_b=stack_vec("ln1_b"),
        wqkv=wqkv, bqkv=bqkv,
        wo=stack_mat("wo"), bo=stack_vec("bo"),
        ln2_g=stack_vec("ln2_g"), ln2_b=stack_vec("ln2_b"),
        w1=stack_mat("w1"), b1=stack_vec("b1"),
        w2=stack_mat("w2"), b2=stack_vec("b2"),
        lnf_g=params["ln_f_g"][None, :], lnf_b=params["ln_f_b"][None, :],
        head_w=head_w.astype(bf16), head_b=head_b,
    )


# ---------------------------------------------------------------------------
# forward pass
# ---------------------------------------------------------------------------
def extract_patches_with_cls_slot(x, patch):
    """NCHW image -> (B, 1+num_patches, C*P*P); row 0 is zero (CLS slot).
    Flattening order (C, P, P) matches nn.Conv2d weight layout."""
    B, C, H, W = x.shape
    P = patch
    x = x.reshape(B, C, H // P, P, W // P, P)
    x = jnp.transpose(x, (0, 2, 4, 1, 3, 5))       # (B, H/P, W/P, C, P, P)
    patches = x.reshape(B, (H // P) * (W // P), C * P * P)
    zero = jnp.zeros((B, 1, C * P * P), patches.dtype)
    return jnp.concatenate([zero, patches], axis=1)


def vit_forward(packed, x, cfg):
    B = x.shape[0]
    P, D, M = cfg["patch_size"], cfg["hidden"], cfg["mlp_dim"]
    L, H, NC = cfg["num_layers"], cfg["num_heads"], cfg["num_classes"]

    patches = extract_patches_with_cls_slot(x, P)   # (B, S, C*P*P)
    _, S, CPP = patches.shape
    scale = 1.0 / math.sqrt(D // H)

    def per_layer(r, c):      # stacked per-layer param (L, r, c)
        return pl.BlockSpec((1, r, c), lambda b, l: (l, 0, 0))

    def shared(shape):        # parameter shared across the whole grid
        return pl.BlockSpec(shape, lambda b, l: (0,) * len(shape))

    logits_pad = pl.pallas_call(
        functools.partial(_vit_kernel, num_heads=H, scale=scale, eps=LN_EPS),
        out_shape=jax.ShapeDtypeStruct((B, 1, NC_PAD), jnp.float32),
        grid=(B, L),
        in_specs=[
            pl.BlockSpec((1, S, CPP), lambda b, l: (b, 0, 0)),   # patches
            shared((CPP, D)),                                    # patch_w
            shared((1, S, D)),                                   # cls_pos
            per_layer(1, D), per_layer(1, D),                    # ln1 g / b
            per_layer(D, 3 * D), per_layer(1, 3 * D),            # wqkv / bqkv
            per_layer(D, D), per_layer(1, D),                    # wo / bo
            per_layer(1, D), per_layer(1, D),                    # ln2 g / b
            per_layer(D, M), per_layer(1, M),                    # w1 / b1
            per_layer(M, D), per_layer(1, D),                    # w2 / b2
            shared((1, D)), shared((1, D)),                      # ln_f g / b
            shared((D, NC_PAD)), shared((1, NC_PAD)),            # head w / b
        ],
        out_specs=pl.BlockSpec((1, 1, NC_PAD), lambda b, l: (b, 0, 0)),
        scratch_shapes=[pltpu.VMEM((S, D), jnp.float32)],        # resident h
        compiler_params=pltpu.CompilerParams(
            dimension_semantics=("parallel", "arbitrary")),
    )(
        patches, packed["patch_w"], packed["cls_pos"],
        packed["ln1_g"], packed["ln1_b"], packed["wqkv"], packed["bqkv"],
        packed["wo"], packed["bo"], packed["ln2_g"], packed["ln2_b"],
        packed["w1"], packed["b1"], packed["w2"], packed["b2"],
        packed["lnf_g"], packed["lnf_b"], packed["head_w"], packed["head_b"],
    )
    return logits_pad[:, 0, :NC]                    # (B, num_classes)


# ---------------------------------------------------------------------------
if __name__ == "__main__":
    cfg = CONFIG
    key = jax.random.PRNGKey(0)
    k_param, k_input = jax.random.split(key)

    params = init_params(k_param, cfg)
    packed = pack_params(params, cfg)

    # NCHW input, matching the PyTorch module's input convention.
    x = jax.random.normal(
        k_input,
        (2, cfg["num_channels"], cfg["image_size"], cfg["image_size"]),
        dtype=jnp.float32,
    )

    fwd = jax.jit(functools.partial(vit_forward, packed, cfg=cfg))
    logits = fwd(x)
    jax.block_until_ready(logits)

    assert logits.shape == (2, cfg["num_classes"])
    assert logits.dtype == jnp.float32
    assert bool(jnp.all(jnp.isfinite(logits)))
    print("KERNEL_OK")
</pallas_src>

<mosaic_0001>
module attributes {stable_mosaic.version = 11 : i64} {
  func.func @_vit_kernel(%arg0: i32, %arg1: i32, %arg2: memref<1x17x192xf32, #tpu.memory_space<vmem>>, %arg3: memref<192x128xbf16, #tpu.memory_space<vmem>>, %arg4: memref<1x17x128xf32, #tpu.memory_space<vmem>>, %arg5: memref<1x1x128xf32, #tpu.memory_space<vmem>>, %arg6: memref<1x1x128xf32, #tpu.memory_space<vmem>>, %arg7: memref<1x128x384xbf16, #tpu.memory_space<vmem>>, %arg8: memref<1x1x384xf32, #tpu.memory_space<vmem>>, %arg9: memref<1x128x128xbf16, #tpu.memory_space<vmem>>, %arg10: memref<1x1x128xf32, #tpu.memory_space<vmem>>, %arg11: memref<1x1x128xf32, #tpu.memory_space<vmem>>, %arg12: memref<1x1x128xf32, #tpu.memory_space<vmem>>, %arg13: memref<1x128x256xbf16, #tpu.memory_space<vmem>>, %arg14: memref<1x1x256xf32, #tpu.memory_space<vmem>>, %arg15: memref<1x256x128xbf16, #tpu.memory_space<vmem>>, %arg16: memref<1x1x128xf32, #tpu.memory_space<vmem>>, %arg17: memref<1x128xf32, #tpu.memory_space<vmem>>, %arg18: memref<1x128xf32, #tpu.memory_space<vmem>>, %arg19: memref<128x128xbf16, #tpu.memory_space<vmem>>, %arg20: memref<1x128xf32, #tpu.memory_space<vmem>>, %arg21: memref<1x1x128xf32, #tpu.memory_space<vmem>>, %arg22: memref<17x128xf32, #tpu.memory_space<vmem>>) attributes {dimension_semantics = [#tpu.dimension_semantics<parallel>, #tpu.dimension_semantics<arbitrary>], iteration_bounds = array<i64: 2, 2>, scalar_prefetch = 0 : i64, scratch_operands = 1 : i64, tpu.core_type = #tpu.core_type<tc>, window_params = [{transform_indices = @transform_0, window_bounds = array<i64: 1, 17, 192>}, {pipeline_mode = #tpu.pipeline_mode<synchronous>, transform_indices = @transform_1, window_bounds = array<i64: 192, 128>}, {pipeline_mode = #tpu.pipeline_mode<synchronous>, transform_indices = @transform_2, window_bounds = array<i64: 1, 17, 128>}, {transform_indices = @transform_3, window_bounds = array<i64: 1, 1, 128>}, {transform_indices = @transform_4, window_bounds = array<i64: 1, 1, 128>}, {transform_indices = @transform_5, window_bounds = array<i64: 1, 128, 384>}, {transform_indices = @transform_6, window_bounds = array<i64: 1, 1, 384>}, {transform_indices = @transform_7, window_bounds = array<i64: 1, 128, 128>}, {transform_indices = @transform_8, window_bounds = array<i64: 1, 1, 128>}, {transform_indices = @transform_9, window_bounds = array<i64: 1, 1, 128>}, {transform_indices = @transform_10, window_bounds = array<i64: 1, 1, 128>}, {transform_indices = @transform_11, window_bounds = array<i64: 1, 128, 256>}, {transform_indices = @transform_12, window_bounds = array<i64: 1, 1, 256>}, {transform_indices = @transform_13, window_bounds = array<i64: 1, 256, 128>}, {transform_indices = @transform_14, window_bounds = array<i64: 1, 1, 128>}, {pipeline_mode = #tpu.pipeline_mode<synchronous>, transform_indices = @transform_15, window_bounds = array<i64: 1, 128>}, {pipeline_mode = #tpu.pipeline_mode<synchronous>, transform_indices = @transform_16, window_bounds = array<i64: 1, 128>}, {pipeline_mode = #tpu.pipeline_mode<synchronous>, transform_indices = @transform_17, window_bounds = array<i64: 128, 128>}, {pipeline_mode = #tpu.pipeline_mode<synchronous>, transform_indices = @transform_18, window_bounds = array<i64: 1, 128>}, {transform_indices = @transform_19, window_bounds = array<i64: 1, 1, 128>}]} {
    %c0_i32 = arith.constant 0 : i32
    %0 = arith.cmpi eq, %arg1, %c0_i32 : i32
    %1 = arith.extui %0 : i1 to i32
    %c0_i32_0 = arith.constant 0 : i32
    %2 = arith.cmpi ne, %1, %c0_i32_0 : i32
    scf.if %2 {
      %c0_69 = arith.constant 0 : index
      %c0_70 = arith.constant 0 : index
      %c0_71 = arith.constant 0 : index
      %154 = vector.load %arg2[%c0_69, %c0_70, %c0_71] : memref<1x17x192xf32, #tpu.memory_space<vmem>>, vector<1x17x192xf32>
      %155 = vector.shape_cast %154 : vector<1x17x192xf32> to vector<17x192xf32>
      %156 = arith.truncf %155 : vector<17x192xf32> to vector<17x192xbf16>
      %c0_72 = arith.constant 0 : index
      %c0_73 = arith.constant 0 : index
      %157 = vector.load %arg3[%c0_72, %c0_73] : memref<192x128xbf16, #tpu.memory_space<vmem>>, vector<192x128xbf16>
      %cst_74 = arith.constant dense<0.000000e+00> : vector<17x128xf32>
      %158 = tpu.matmul %156, %157, %cst_74 {dimension_numbers = #tpu.dot_dimension_numbers<[1], [0], [0], [1], [0, 0, 1, 1], [], []>} : vector<17x192xbf16>, vector<192x128xbf16>, vector<17x128xf32> -> vector<17x128xf32>
      %c0_75 = arith.constant 0 : index
      %c0_76 = arith.constant 0 : index
      %c0_77 = arith.constant 0 : index
      %159 = vector.load %arg4[%c0_75, %c0_76, %c0_77] : memref<1x17x128xf32, #tpu.memory_space<vmem>>, vector<1x17x128xf32>
      %160 = vector.shape_cast %159 : vector<1x17x128xf32> to vector<17x128xf32>
      %161 = arith.addf %158, %160 : vector<17x128xf32>
      %c0_78 = arith.constant 0 : index
      %c0_79 = arith.constant 0 : index
      %162 = vector.load %arg22[%c0_78, %c0_79] : memref<17x128xf32, #tpu.memory_space<vmem>>, vector<17x128xf32>
      tpu.vector_store %arg22[%c0_78, %c0_79], %161 {strides = array<i32>} : memref<17x128xf32, #tpu.memory_space<vmem>>, vector<17x128xf32>,
    } else {
    }
    %c0 = arith.constant 0 : index
    %c0_1 = arith.constant 0 : index
    %3 = vector.load %arg22[%c0, %c0_1] : memref<17x128xf32, #tpu.memory_space<vmem>>, vector<17x128xf32>
    %c0_2 = arith.constant 0 : index
    %c0_3 = arith.constant 0 : index
    %c0_4 = arith.constant 0 : index
    %4 = vector.load %arg5[%c0_2, %c0_3, %c0_4] : memref<1x1x128xf32, #tpu.memory_space<vmem>>, vector<1x1x128xf32>
    %5 = vector.shape_cast %4 : vector<1x1x128xf32> to vector<1x128xf32>
    %c0_5 = arith.constant 0 : index
    %c0_6 = arith.constant 0 : index
    %c0_7 = arith.constant 0 : index
    %6 = vector.load %arg6[%c0_5, %c0_6, %c0_7] : memref<1x1x128xf32, #tpu.memory_space<vmem>>, vector<1x1x128xf32>
    %7 = vector.shape_cast %6 : vector<1x1x128xf32> to vector<1x128xf32>
    %cst = arith.constant dense<0.000000e+00> : vector<17xf32>
    %8 = vector.multi_reduction <add>, %3, %cst [1] : vector<17x128xf32> to vector<17xf32>
    %9 = vector.shape_cast %8 : vector<17xf32> to vector<17x1xf32>
    %cst_8 = arith.constant 1.280000e+02 : f32
    %10 = vector.broadcast %cst_8 : f32 to vector<17x1xf32>
    %11 = arith.divf %9, %10 : vector<17x1xf32>
    %12 = vector.broadcast %11 : vector<17x1xf32> to vector<17x128xf32>
    %13 = arith.subf %3, %12 : vector<17x128xf32>
    %14 = arith.mulf %13, %13 : vector<17x128xf32>
    %cst_9 = arith.constant dense<0.000000e+00> : vector<17xf32>
    %15 = vector.multi_reduction <add>, %14, %cst_9 [1] : vector<17x128xf32> to vector<17xf32>
    %16 = vector.shape_cast %15 : vector<17xf32> to vector<17x1xf32>
    %cst_10 = arith.constant 1.280000e+02 : f32
    %17 = vector.broadcast %cst_10 : f32 to vector<17x1xf32>
    %18 = arith.divf %16, %17 : vector<17x1xf32>
    %19 = vector.broadcast %11 : vector<17x1xf32> to vector<17x128xf32>
    %20 = arith.subf %3, %19 : vector<17x128xf32>
    %cst_11 = arith.constant 9.99999996E-13 : f32
    %21 = vector.broadcast %cst_11 : f32 to vector<17x1xf32>
    %22 = arith.addf %18, %21 : vector<17x1xf32>
    %23 = math.rsqrt %22 : vector<17x1xf32>
    %24 = vector.broadcast %23 : vector<17x1xf32> to vector<17x128xf32>
    %25 = arith.mulf %20, %24 : vector<17x128xf32>
    %26 = vector.broadcast %5 : vector<1x128xf32> to vector<17x128xf32>
    %27 = arith.mulf %25, %26 : vector<17x128xf32>
    %28 = vector.broadcast %7 : vector<1x128xf32> to vector<17x128xf32>
    %29 = arith.addf %27, %28 : vector<17x128xf32>
    %30 = arith.truncf %29 : vector<17x128xf32> to vector<17x128xbf16>
    %c0_12 = arith.constant 0 : index
    %c0_13 = arith.constant 0 : index
    %c0_14 = arith.constant 0 : index
    %31 = vector.load %arg7[%c0_12, %c0_13, %c0_14] : memref<1x128x384xbf16, #tpu.memory_space<vmem>>, vector<1x128x384xbf16>
    %32 = vector.shape_cast %31 : vector<1x128x384xbf16> to vector<128x384xbf16>
    %cst_15 = arith.constant dense<0.000000e+00> : vector<17x384xf32>
    %33 = tpu.matmul %30, %32, %cst_15 {dimension_numbers = #tpu.dot_dimension_numbers<[1], [0], [0], [1], [0, 0, 1, 1], [], []>} : vector<17x128xbf16>, vector<128x384xbf16>, vector<17x384xf32> -> vector<17x384xf32>
    %c0_16 = arith.constant 0 : index
    %c0_17 = arith.constant 0 : index
    %c0_18 = arith.constant 0 : index
    %34 = vector.load %arg8[%c0_16, %c0_17, %c0_18] : memref<1x1x384xf32, #tpu.memory_space<vmem>>, vector<1x1x384xf32>
    %35 = vector.shape_cast %34 : vector<1x1x384xf32> to vector<1x384xf32>
    %36 = vector.broadcast %35 : vector<1x384xf32> to vector<17x384xf32>
    %37 = arith.addf %33, %36 : vector<17x384xf32>
    %c0_19 = arith.constant 0 : index
    %c0_20 = arith.constant 0 : index
    %c0_21 = arith.constant 0 : index
    %38 = vector.load %arg9[%c0_19, %c0_20, %c0_21] : memref<1x128x128xbf16, #tpu.memory_space<vmem>>, vector<1x128x128xbf16>
    %39 = vector.shape_cast %38 : vector<1x128x128xbf16> to vector<128x128xbf16>
    %40 = vector.extract_strided_slice %37 {offsets = [0, 0], sizes = [17, 64], strides = [1, 1]} : vector<17x384xf32> to vector<17x64xf32>
    %41 = vector.extract_strided_slice %37 {offsets = [0, 128], sizes = [17, 64], strides = [1, 1]} : vector<17x384xf32> to vector<17x64xf32>
    %42 = vector.extract_strided_slice %37 {offsets = [0, 256], sizes = [17, 64], strides = [1, 1]} : vector<17x384xf32> to vector<17x64xf32>
    %43 = arith.truncf %40 : vector<17x64xf32> to vector<17x64xbf16>
    %44 = arith.truncf %41 : vector<17x64xf32> to vector<17x64xbf16>
    "tpu.trace_start"() <{level = 10 : i32, message = "qd,kd->qk"}> : () -> ()
    %cst_22 = arith.constant dense<0.000000e+00> : vector<17x17xf32>
    %45 = tpu.matmul %43, %44, %cst_22 {dimension_numbers = #tpu.dot_dimension_numbers<[1], [1], [0], [0], [0, 0, 1, 0], [], []>} : vector<17x64xbf16>, vector<17x64xbf16>, vector<17x17xf32> -> vector<17x17xf32>
    "tpu.trace_stop"() : () -> ()
    %cst_23 = arith.constant 1.250000e-01 : f32
    %46 = vector.broadcast %cst_23 : f32 to vector<17x17xf32>
    %47 = arith.mulf %45, %46 : vector<17x17xf32>
    %cst_24 = arith.constant dense<0xFF800000> : vector<17xf32>
    %48 = vector.multi_reduction <maximumf>, %47, %cst_24 [1] : vector<17x17xf32> to vector<17xf32>
    %49 = vector.shape_cast %48 : vector<17xf32> to vector<17x1xf32>
    %50 = vector.broadcast %49 : vector<17x1xf32> to vector<17x17xf32>
    %51 = arith.subf %47, %50 : vector<17x17xf32>
    %52 = math.exp %51 : vector<17x17xf32>
    %cst_25 = arith.constant dense<0.000000e+00> : vector<17xf32>
    %53 = vector.multi_reduction <add>, %52, %cst_25 [1] : vector<17x17xf32> to vector<17xf32>
    %54 = vector.shape_cast %53 : vector<17xf32> to vector<17x1xf32>
    %55 = tpu.reciprocal %54 {approx = true} : vector<17x1xf32> -> vector<17x1xf32>
    %56 = arith.truncf %52 : vector<17x17xf32> to vector<17x17xbf16>
    %57 = arith.truncf %42 : vector<17x64xf32> to vector<17x64xbf16>
    "tpu.trace_start"() <{level = 10 : i32, message = "qk,kd->qd"}> : () -> ()
    %cst_26 = arith.constant dense<0.000000e+00> : vector<17x64xf32>
    %58 = tpu.matmul %56, %57, %cst_26 {dimension_numbers = #tpu.dot_dimension_numbers<[1], [0], [0], [1], [0, 0, 1, 1], [], []>} : vector<17x17xbf16>, vector<17x64xbf16>, vector<17x64xf32> -> vector<17x64xf32>
    "tpu.trace_stop"() : () -> ()
    %59 = vector.broadcast %55 : vector<17x1xf32> to vector<17x64xf32>
    %60 = arith.mulf %58, %59 : vector<17x64xf32>
    %61 = arith.truncf %60 : vector<17x64xf32> to vector<17x64xbf16>
    %62 = vector.extract_strided_slice %39 {offsets = [0, 0], sizes = [64, 128], strides = [1, 1]} : vector<128x128xbf16> to vector<64x128xbf16>
    %cst_27 = arith.constant dense<0.000000e+00> : vector<17x128xf32>
    %63 = tpu.matmul %61, %62, %cst_27 {dimension_numbers = #tpu.dot_dimension_numbers<[1], [0], [0], [1], [0, 0, 1, 1], [], []>} : vector<17x64xbf16>, vector<64x128xbf16>, vector<17x128xf32> -> vector<17x128xf32>
    %64 = vector.extract_strided_slice %37 {offsets = [0, 64], sizes = [17, 64], strides = [1, 1]} : vector<17x384xf32> to vector<17x64xf32>
    %65 = vector.extract_strided_slice %37 {offsets = [0, 192], sizes = [17, 64], strides = [1, 1]} : vector<17x384xf32> to vector<17x64xf32>
    %66 = vector.extract_strided_slice %37 {offsets = [0, 320], sizes = [17, 64], strides = [1, 1]} : vector<17x384xf32> to vector<17x64xf32>
    %67 = arith.truncf %64 : vector<17x64xf32> to vector<17x64xbf16>
    %68 = arith.truncf %65 : vector<17x64xf32> to vector<17x64xbf16>
    "tpu.trace_start"() <{level = 10 : i32, message = "qd,kd->qk"}> : () -> ()
    %cst_28 = arith.constant dense<0.000000e+00> : vector<17x17xf32>
    %69 = tpu.matmul %67, %68, %cst_28 {dimension_numbers = #tpu.dot_dimension_numbers<[1], [1], [0], [0], [0, 0, 1, 0], [], []>} : vector<17x64xbf16>, vector<17x64xbf16>, vector<17x17xf32> -> vector<17x17xf32>
    "tpu.trace_stop"() : () -> ()
    %cst_29 = arith.constant 1.250000e-01 : f32
    %70 = vector.broadcast %cst_29 : f32 to vector<17x17xf32>
    %71 = arith.mulf %69, %70 : vector<17x17xf32>
    %cst_30 = arith.constant dense<0xFF800000> : vector<17xf32>
    %72 = vector.multi_reduction <maximumf>, %71, %cst_30 [1] : vector<17x17xf32> to vector<17xf32>
    %73 = vector.shape_cast %72 : vector<17xf32> to vector<17x1xf32>
    %74 = vector.broadcast %73 : vector<17x1xf32> to vector<17x17xf32>
    %75 = arith.subf %71, %74 : vector<17x17xf32>
    %76 = math.exp %75 : vector<17x17xf32>
    %cst_31 = arith.constant dense<0.000000e+00> : vector<17xf32>
    %77 = vector.multi_reduction <add>, %76, %cst_31 [1] : vector<17x17xf32> to vector<17xf32>
    %78 = vector.shape_cast %77 : vector<17xf32> to vector<17x1xf32>
    %79 = tpu.reciprocal %78 {approx = true} : vector<17x1xf32> -> vector<17x1xf32>
    %80 = arith.truncf %76 : vector<17x17xf32> to vector<17x17xbf16>
    %81 = arith.truncf %66 : vector<17x64xf32> to vector<17x64xbf16>
    "tpu.trace_start"() <{level = 10 : i32, message = "qk,kd->qd"}> : () -> ()
    %cst_32 = arith.constant dense<0.000000e+00> : vector<17x64xf32>
    %82 = tpu.matmul %80, %81, %cst_32 {dimension_numbers = #tpu.dot_dimension_numbers<[1], [0], [0], [1], [0, 0, 1, 1], [], []>} : vector<17x17xbf16>, vector<17x64xbf16>, vector<17x64xf32> -> vector<17x64xf32>
    "tpu.trace_stop"() : () -> ()
    %83 = vector.broadcast %79 : vector<17x1xf32> to vector<17x64xf32>
    %84 = arith.mulf %82, %83 : vector<17x64xf32>
    %85 = arith.truncf %84 : vector<17x64xf32> to vector<17x64xbf16>
    %86 = vector.extract_strided_slice %39 {offsets = [64, 0], sizes = [64, 128], strides = [1, 1]} : vector<128x128xbf16> to vector<64x128xbf16>
    %cst_33 = arith.constant dense<0.000000e+00> : vector<17x128xf32>
    %87 = tpu.matmul %85, %86, %cst_33 {dimension_numbers = #tpu.dot_dimension_numbers<[1], [0], [0], [1], [0, 0, 1, 1], [], []>} : vector<17x64xbf16>, vector<64x128xbf16>, vector<17x128xf32> -> vector<17x128xf32>
    %88 = arith.addf %63, %87 : vector<17x128xf32>
    %c0_34 = arith.constant 0 : index
    %c0_35 = arith.constant 0 : index
    %c0_36 = arith.constant 0 : index
    %89 = vector.load %arg10[%c0_34, %c0_35, %c0_36] : memref<1x1x128xf32, #tpu.memory_space<vmem>>, vector<1x1x128xf32>
    %90 = vector.shape_cast %89 : vector<1x1x128xf32> to vector<1x128xf32>
    %91 = vector.broadcast %90 : vector<1x128xf32> to vector<17x128xf32>
    %92 = arith.addf %88, %91 : vector<17x128xf32>
    %93 = arith.addf %3, %92 : vector<17x128xf32>
    %c0_37 = arith.constant 0 : index
    %c0_38 = arith.constant 0 : index
    %c0_39 = arith.constant 0 : index
    %94 = vector.load %arg11[%c0_37, %c0_38, %c0_39] : memref<1x1x128xf32, #tpu.memory_space<vmem>>, vector<1x1x128xf32>
    %95 = vector.shape_cast %94 : vector<1x1x128xf32> to vector<1x128xf32>
    %c0_40 = arith.constant 0 : index
    %c0_41 = arith.constant 0 : index
    %c0_42 = arith.constant 0 : index
    %96 = vector.load %arg12[%c0_40, %c0_41, %c0_42] : memref<1x1x128xf32, #tpu.memory_space<vmem>>, vector<1x1x128xf32>
    %97 = vector.shape_cast %96 : vector<1x1x128xf32> to vector<1x128xf32>
    %cst_43 = arith.constant dense<0.000000e+00> : vector<17xf32>
    %98 = vector.multi_reduction <add>, %93, %cst_43 [1] : vector<17x128xf32> to vector<17xf32>
    %99 = vector.shape_cast %98 : vector<17xf32> to vector<17x1xf32>
    %cst_44 = arith.constant 1.280000e+02 : f32
    %100 = vector.broadcast %cst_44 : f32 to vector<17x1xf32>
    %101 = arith.divf %99, %100 : vector<17x1xf32>
    %102 = vector.broadcast %101 : vector<17x1xf32> to vector<17x128xf32>
    %103 = arith.subf %93, %102 : vector<17x128xf32>
    %104 = arith.mulf %103, %103 : vector<17x128xf32>
    %cst_45 = arith.constant dense<0.000000e+00> : vector<17xf32>
    %105 = vector.multi_reduction <add>, %104, %cst_45 [1] : vector<17x128xf32> to vector<17xf32>
    %106 = vector.shape_cast %105 : vector<17xf32> to vector<17x1xf32>
    %cst_46 = arith.constant 1.280000e+02 : f32
    %107 = vector.broadcast %cst_46 : f32 to vector<17x1xf32>
    %108 = arith.divf %106, %107 : vector<17x1xf32>
    %109 = vector.broadcast %101 : vector<17x1xf32> to vector<17x128xf32>
    %110 = arith.subf %93, %109 : vector<17x128xf32>
    %cst_47 = arith.constant 9.99999996E-13 : f32
    %111 = vector.broadcast %cst_47 : f32 to vector<17x1xf32>
    %112 = arith.addf %108, %111 : vector<17x1xf32>
    %113 = math.rsqrt %112 : vector<17x1xf32>
    %114 = vector.broadcast %113 : vector<17x1xf32> to vector<17x128xf32>
    %115 = arith.mulf %110, %114 : vector<17x128xf32>
    %116 = vector.broadcast %95 : vector<1x128xf32> to vector<17x128xf32>
    %117 = arith.mulf %115, %116 : vector<17x128xf32>
    %118 = vector.broadcast %97 : vector<1x128xf32> to vector<17x128xf32>
    %119 = arith.addf %117, %118 : vector<17x128xf32>
    %120 = arith.truncf %119 : vector<17x128xf32> to vector<17x128xbf16>
    %c0_48 = arith.constant 0 : index
    %c0_49 = arith.constant 0 : index
    %c0_50 = arith.constant 0 : index
    %121 = vector.load %arg13[%c0_48, %c0_49, %c0_50] : memref<1x128x256xbf16, #tpu.memory_space<vmem>>, vector<1x128x256xbf16>
    %122 = vector.shape_cast %121 : vector<1x128x256xbf16> to vector<128x256xbf16>
    %cst_51 = arith.constant dense<0.000000e+00> : vector<17x256xf32>
    %123 = tpu.matmul %120, %122, %cst_51 {dimension_numbers = #tpu.dot_dimension_numbers<[1], [0], [0], [1], [0, 0, 1, 1], [], []>} : vector<17x128xbf16>, vector<128x256xbf16>, vector<17x256xf32> -> vector<17x256xf32>
    %c0_52 = arith.constant 0 : index
    %c0_53 = arith.constant 0 : index
    %c0_54 = arith.constant 0 : index
    %124 = vector.load %arg14[%c0_52, %c0_53, %c0_54] : memref<1x1x256xf32, #tpu.memory_space<vmem>>, vector<1x1x256xf32>
    %125 = vector.shape_cast %124 : vector<1x1x256xf32> to vector<1x256xf32>
    %126 = vector.broadcast %125 : vector<1x256xf32> to vector<17x256xf32>
    %127 = arith.addf %123, %126 : vector<17x256xf32>
    %128 = arith.mulf %127, %127 : vector<17x256xf32>
    %129 = arith.mulf %127, %128 : vector<17x256xf32>
    %cst_55 = arith.constant 4.471500e-02 : f32
    %130 = vector.broadcast %cst_55 : f32 to vector<17x256xf32>
    %131 = arith.mulf %130, %129 : vector<17x256xf32>
    %132 = arith.addf %127, %131 : vector<17x256xf32>
    %cst_56 = arith.constant 0.797884583 : f32
    %133 = vector.broadcast %cst_56 : f32 to vector<17x256xf32>
    %134 = arith.mulf %133, %132 : vector<17x256xf32>
    %135 = math.tanh %134 : vector<17x256xf32>
    %cst_57 = arith.constant 1.000000e+00 : f32
    %136 = vector.broadcast %cst_57 : f32 to vector<17x256xf32>
    %137 = arith.addf %136, %135 : vector<17x256xf32>
    %cst_58 = arith.constant 5.000000e-01 : f32
    %138 = vector.broadcast %cst_58 : f32 to vector<17x256xf32>
    %139 = arith.mulf %138, %137 : vector<17x256xf32>
    %140 = arith.mulf %127, %139 : vector<17x256xf32>
    %141 = arith.truncf %140 : vector<17x256xf32> to vector<17x256xbf16>
    %c0_59 = arith.constant 0 : index
    %c0_60 = arith.constant 0 : index
    %c0_61 = arith.constant 0 : index
    %142 = vector.load %arg15[%c0_59, %c0_60, %c0_61] : memref<1x256x128xbf16, #tpu.memory_space<vmem>>, vector<1x256x128xbf16>
    %143 = vector.shape_cast %142 : vector<1x256x128xbf16> to vector<256x128xbf16>
    %cst_62 = arith.constant dense<0.000000e+00> : vector<17x128xf32>
    %144 = tpu.matmul %141, %143, %cst_62 {dimension_numbers = #tpu.dot_dimension_numbers<[1], [0], [0], [1], [0, 0, 1, 1], [], []>} : vector<17x256xbf16>, vector<256x128xbf16>, vector<17x128xf32> -> vector<17x128xf32>
    %c0_63 = arith.constant 0 : index
    %c0_64 = arith.constant 0 : index
    %c0_65 = arith.constant 0 : index
    %145 = vector.load %arg16[%c0_63, %c0_64, %c0_65] : memref<1x1x128xf32, #tpu.memory_space<vmem>>, vector<1x1x128xf32>
    %146 = vector.shape_cast %145 : vector<1x1x128xf32> to vector<1x128xf32>
    %147 = vector.broadcast %146 : vector<1x128xf32> to vector<17x128xf32>
    %148 = arith.addf %144, %147 : vector<17x128xf32>
    %149 = arith.addf %93, %148 : vector<17x128xf32>
    %c0_66 = arith.constant 0 : index
    %c0_67 = arith.constant 0 : index
    %150 = vector.load %arg22[%c0_66, %c0_67] : memref<17x128xf32, #tpu.memory_space<vmem>>, vector<17x128xf32>
    tpu.vector_store %arg22[%c0_66, %c0_67], %149 {strides = array<i32>} : memref<17x128xf32, #tpu.memory_space<vmem>>, vector<17x128xf32>,
    %c1_i32 = arith.constant 1 : i32
    %151 = arith.cmpi eq, %arg1, %c1_i32 : i32
    %152 = arith.extui %151 : i1 to i32
    %c0_i32_68 = arith.constant 0 : i32
    %153 = arith.cmpi ne, %152, %c0_i32_68 : i32
    scf.if %153 {
      %154 = vector.extract_strided_slice %149 {offsets = [0, 0], sizes = [1, 128], strides = [1, 1]} : vector<17x128xf32> to vector<1x128xf32>
      %c0_69 = arith.constant 0 : index
      %c0_70 = arith.constant 0 : index
      %155 = vector.load %arg17[%c0_69, %c0_70] : memref<1x128xf32, #tpu.memory_space<vmem>>, vector<1x128xf32>
      %c0_71 = arith.constant 0 : index
      %c0_72 = arith.constant 0 : index
      %156 = vector.load %arg18[%c0_71, %c0_72] : memref<1x128xf32, #tpu.memory_space<vmem>>, vector<1x128xf32>
      %cst_73 = arith.constant dense<0.000000e+00> : vector<1xf32>
      %157 = vector.multi_reduction <add>, %154, %cst_73 [1] : vector<1x128xf32> to vector<1xf32>
      %158 = vector.shape_cast %157 : vector<1xf32> to vector<1x1xf32>
      %cst_74 = arith.constant 1.280000e+02 : f32
      %159 = vector.broadcast %cst_74 : f32 to vector<1x1xf32>
      %160 = arith.divf %158, %159 : vector<1x1xf32>
      %161 = vector.broadcast %160 : vector<1x1xf32> to vector<1x128xf32>
      %162 = arith.subf %154, %161 : vector<1x128xf32>
      %163 = arith.mulf %162, %162 : vector<1x128xf32>
      %cst_75 = arith.constant dense<0.000000e+00> : vector<1xf32>
      %164 = vector.multi_reduction <add>, %163, %cst_75 [1] : vector<1x128xf32> to vector<1xf32>
      %165 = vector.shape_cast %164 : vector<1xf32> to vector<1x1xf32>
      %cst_76 = arith.constant 1.280000e+02 : f32
      %166 = vector.broadcast %cst_76 : f32 to vector<1x1xf32>
      %167 = arith.divf %165, %166 : vector<1x1xf32>
      %168 = vector.broadcast %160 : vector<1x1xf32> to vector<1x128xf32>
      %169 = arith.subf %154, %168 : vector<1x128xf32>
      %cst_77 = arith.constant 9.99999996E-13 : f32
      %170 = vector.broadcast %cst_77 : f32 to vector<1x1xf32>
      %171 = arith.addf %167, %170 : vector<1x1xf32>
      %172 = math.rsqrt %171 : vector<1x1xf32>
      %173 = vector.broadcast %172 : vector<1x1xf32> to vector<1x128xf32>
      %174 = arith.mulf %169, %173 : vector<1x128xf32>
      %175 = arith.mulf %174, %155 : vector<1x128xf32>
      %176 = arith.addf %175, %156 : vector<1x128xf32>
      %177 = arith.truncf %176 : vector<1x128xf32> to vector<1x128xbf16>
      %c0_78 = arith.constant 0 : index
      %c0_79 = arith.constant 0 : index
      %178 = vector.load %arg19[%c0_78, %c0_79] : memref<128x128xbf16, #tpu.memory_space<vmem>>, vector<128x128xbf16>
      %cst_80 = arith.constant dense<0.000000e+00> : vector<1x128xf32>
      %179 = tpu.matmul %177, %178, %cst_80 {dimension_numbers = #tpu.dot_dimension_numbers<[1], [0], [0], [1], [0, 0, 1, 1], [], []>} : vector<1x128xbf16>, vector<128x128xbf16>, vector<1x128xf32> -> vector<1x128xf32>
      %c0_81 = arith.constant 0 : index
      %c0_82 = arith.constant 0 : index
      %180 = vector.load %arg20[%c0_81, %c0_82] : memref<1x128xf32, #tpu.memory_space<vmem>>, vector<1x128xf32>
      %181 = arith.addf %179, %180 : vector<1x128xf32>
      %c0_83 = arith.constant 0 : index
      %c0_84 = arith.constant 0 : index
      %c0_85 = arith.constant 0 : index
      %182 = vector.load %arg21[%c0_83, %c0_84, %c0_85] : memref<1x1x128xf32, #tpu.memory_space<vmem>>, vector<1x1x128xf32>
      %183 = vector.shape_cast %182 : vector<1x1x128xf32> to vector<1x128xf32>
      %184 = vector.shape_cast %181 : vector<1x128xf32> to vector<1x1x128xf32>
      tpu.vector_store %arg21[%c0_83, %c0_84, %c0_85], %184 {strides = array<i32>} : memref<1x1x128xf32, #tpu.memory_space<vmem>>, vector<1x1x128xf32>,
    } else {
    }
    return
  }
  func.func @transform_0(%arg0: i32, %arg1: i32) -> (i32, i32, i32) {
    %c0_i32 = arith.constant 0 : i32
    %c0_i32_0 = arith.constant 0 : i32
    %c0_i32_1 = arith.constant 0 : i32
    return %arg0, %c0_i32, %c0_i32_0 : i32, i32, i32
  }
  func.func @transform_1(%arg0: i32, %arg1: i32) -> (i32, i32) {
    %c0_i32 = arith.constant 0 : i32
    %c0_i32_0 = arith.constant 0 : i32
    %c0_i32_1 = arith.constant 0 : i32
    return %c0_i32, %c0_i32_0 : i32, i32
  }
  func.func @transform_2(%arg0: i32, %arg1: i32) -> (i32, i32, i32) {
    %c0_i32 = arith.constant 0 : i32
    %c0_i32_0 = arith.constant 0 : i32
    %c0_i32_1 = arith.constant 0 : i32
    %c0_i32_2 = arith.constant 0 : i32
    return %c0_i32, %c0_i32_0, %c0_i32_1 : i32, i32, i32
  }
  func.func @transform_3(%arg0: i32, %arg1: i32) -> (i32, i32, i32) {
    %c0_i32 = arith.constant 0 : i32
    %c0_i32_0 = arith.constant 0 : i32
    %c0_i32_1 = arith.constant 0 : i32
    return %arg1, %c0_i32, %c0_i32_0 : i32, i32, i32
  }
  func.func @transform_4(%arg0: i32, %arg1: i32) -> (i32, i32, i32) {
    %c0_i32 = arith.constant 0 : i32
    %c0_i32_0 = arith.constant 0 : i32
    %c0_i32_1 = arith.constant 0 : i32
    return %arg1, %c0_i32, %c0_i32_0 : i32, i32, i32
  }
  func.func @transform_5(%arg0: i32, %arg1: i32) -> (i32, i32, i32) {
    %c0_i32 = arith.constant 0 : i32
    %c0_i32_0 = arith.constant 0 : i32
    %c0_i32_1 = arith.constant 0 : i32
    return %arg1, %c0_i32, %c0_i32_0 : i32, i32, i32
  }
  func.func @transform_6(%arg0: i32, %arg1: i32) -> (i32, i32, i32) {
    %c0_i32 = arith.constant 0 : i32
    %c0_i32_0 = arith.constant 0 : i32
    %c0_i32_1 = arith.constant 0 : i32
    return %arg1, %c0_i32, %c0_i32_0 : i32, i32, i32
  }
  func.func @transform_7(%arg0: i32, %arg1: i32) -> (i32, i32, i32) {
    %c0_i32 = arith.constant 0 : i32
    %c0_i32_0 = arith.constant 0 : i32
    %c0_i32_1 = arith.constant 0 : i32
    return %arg1, %c0_i32, %c0_i32_0 : i32, i32, i32
  }
  func.func @transform_8(%arg0: i32, %arg1: i32) -> (i32, i32, i32) {
    %c0_i32 = arith.constant 0 : i32
    %c0_i32_0 = arith.constant 0 : i32
    %c0_i32_1 = arith.constant 0 : i32
    return %arg1, %c0_i32, %c0_i32_0 : i32, i32, i32
  }
  func.func @transform_9(%arg0: i32, %arg1: i32) -> (i32, i32, i32) {
    %c0_i32 = arith.constant 0 : i32
    %c0_i32_0 = arith.constant 0 : i32
    %c0_i32_1 = arith.constant 0 : i32
    return %arg1, %c0_i32, %c0_i32_0 : i32, i32, i32
  }
  func.func @transform_10(%arg0: i32, %arg1: i32) -> (i32, i32, i32) {
    %c0_i32 = arith.constant 0 : i32
    %c0_i32_0 = arith.constant 0 : i32
    %c0_i32_1 = arith.constant 0 : i32
    return %arg1, %c0_i32, %c0_i32_0 : i32, i32, i32
  }
  func.func @transform_11(%arg0: i32, %arg1: i32) -> (i32, i32, i32) {
    %c0_i32 = arith.constant 0 : i32
    %c0_i32_0 = arith.constant 0 : i32
    %c0_i32_1 = arith.constant 0 : i32
    return %arg1, %c0_i32, %c0_i32_0 : i32, i32, i32
  }
  func.func @transform_12(%arg0: i32, %arg1: i32) -> (i32, i32, i32) {
    %c0_i32 = arith.constant 0 : i32
    %c0_i32_0 = arith.constant 0 : i32
    %c0_i32_1 = arith.constant 0 : i32
    return %arg1, %c0_i32, %c0_i32_0 : i32, i32, i32
  }
  func.func @transform_13(%arg0: i32, %arg1: i32) -> (i32, i32, i32) {
    %c0_i32 = arith.constant 0 : i32
    %c0_i32_0 = arith.constant 0 : i32
    %c0_i32_1 = arith.constant 0 : i32
    return %arg1, %c0_i32, %c0_i32_0 : i32, i32, i32
  }
  func.func @transform_14(%arg0: i32, %arg1: i32) -> (i32, i32, i32) {
    %c0_i32 = arith.constant 0 : i32
    %c0_i32_0 = arith.constant 0 : i32
    %c0_i32_1 = arith.constant 0 : i32
    return %arg1, %c0_i32, %c0_i32_0 : i32, i32, i32
  }
  func.func @transform_15(%arg0: i32, %arg1: i32) -> (i32, i32) {
    %c0_i32 = arith.constant 0 : i32
    %c0_i32_0 = arith.constant 0 : i32
    %c0_i32_1 = arith.constant 0 : i32
    return %c0_i32, %c0_i32_0 : i32, i32
  }
  func.func @transform_16(%arg0: i32, %arg1: i32) -> (i32, i32) {
    %c0_i32 = arith.constant 0 : i32
    %c0_i32_0 = arith.constant 0 : i32
    %c0_i32_1 = arith.constant 0 : i32
    return %c0_i32, %c0_i32_0 : i32, i32
  }
  func.func @transform_17(%arg0: i32, %arg1: i32) -> (i32, i32) {
    %c0_i32 = arith.constant 0 : i32
    %c0_i32_0 = arith.constant 0 : i32
    %c0_i32_1 = arith.constant 0 : i32
    return %c0_i32, %c0_i32_0 : i32, i32
  }
  func.func @transform_18(%arg0: i32, %arg1: i32) -> (i32, i32) {
    %c0_i32 = arith.constant 0 : i32
    %c0_i32_0 = arith.constant 0 : i32
    %c0_i32_1 = arith.constant 0 : i32
    return %c0_i32, %c0_i32_0 : i32, i32
  }
  func.func @transform_19(%arg0: i32, %arg1: i32) -> (i32, i32, i32) {
    %c0_i32 = arith.constant 0 : i32
    %c0_i32_0 = arith.constant 0 : i32
    %c0_i32_1 = arith.constant 0 : i32
    return %arg0, %c0_i32, %c0_i32_0 : i32, i32, i32
  }
}

</mosaic_0001>

<bundles_post_ra>
// kernel: vit_forward.1
= control target key start
LH: loop header
LB: loop body
LE: loop exit
PB: predicated region body
PF: predicated region fallthrough
CT: control target
= control target key end

     0   :  { %s3729_s0 = inlined_call_operand.vmem [shape: f32[2,17,192], index: 0, kind: input, shape index: {}]   ;;  %s3730_s1 = inlined_call_operand.vmem [shape: bf16[192,128], index: 1, kind: input, shape index: {}]   ;;  %s3731_s2 = inlined_call_operand.vmem [shape: f32[1,17,128], index: 2, kind: input, shape index: {}]   ;;  %s3732_s3 = inlined_call_operand.vmem [shape: f32[2,1,128], index: 3, kind: input, shape index: {}, may-alias: {3,9}]   ;;  %s3733_s4 = inlined_call_operand.vmem [shape: f32[2,1,128], index: 4, kind: input, shape index: {}, may-alias: {4,8,10,14}]   ;;  %s3734_s5 = inlined_call_operand.vmem [shape: bf16[2,128,384], index: 5, kind: input, shape index: {}]   ;;  %s3735_s6 = inlined_call_operand.vmem [shape: f32[2,1,384], index: 6, kind: input, shape index: {}]   ;;  %s3736_s7 = inlined_call_operand.vmem [shape: bf16[2,128,128], index: 7, kind: input, shape index: {}]   ;;  %s3737_s8 = inlined_call_operand.vmem [shape: f32[2,1,128], index: 8, kind: input, shape index: {}, may-alias: {4,8,10,14}]   ;;  %s3738_s9 = inlined_call_operand.vmem [shape: f32[2,1,128], index: 9, kind: input, shape index: {}, may-alias: {3,9}]   ;;  %s3739_s10 = inlined_call_operand.vmem [shape: f32[2,1,128], index: 10, kind: input, shape index: {}, may-alias: {4,8,10,14}]   ;;  %s3740_s11 = inlined_call_operand.vmem [shape: bf16[2,128,256], index: 11, kind: input, shape index: {}]   ;;  %s3741_s12 = inlined_call_operand.vmem [shape: f32[2,1,256], index: 12, kind: input, shape index: {}]   ;;  %s3742_s13 = inlined_call_operand.vmem [shape: bf16[2,256,128], index: 13, kind: input, shape index: {}]   ;;  %s3743_s14 = inlined_call_operand.vmem [shape: f32[2,1,128], index: 14, kind: input, shape index: {}, may-alias: {4,8,10,14}]   ;;  %s3744_s15 = inlined_call_operand.vmem [shape: f32[1,128], index: 15, kind: input, shape index: {}]   ;;  %s3745_s16 = inlined_call_operand.vmem [shape: f32[1,128], index: 16, kind: input, shape index: {}, may-alias: {16,18}]   ;;  %s3746_s17 = inlined_call_operand.vmem [shape: bf16[128,128], index: 17, kind: input, shape index: {}]   ;;  %s3747_s18 = inlined_call_operand.vmem [shape: f32[1,128], index: 18, kind: input, shape index: {}, may-alias: {16,18}]   ;;  %s3748_s19 = inlined_call_operand.hbm [shape: f32[2,1,128], index: 19, kind: output, shape index: {}]  }
   0x1   :  { %3765 = sst [smem:[#allocation18_spill]] %s3729_s0 }
   0x2   :  { %3766 = sst [smem:[#allocation19_spill]] %s3730_s1 }
   0x3   :  { %3767 = sst [smem:[#allocation20_spill]] %s3731_s2 }
   0x4   :  { %3768 = sst [smem:[#allocation21_spill]] %s3732_s3 }
   0x5   :  { %3769 = sst [smem:[#allocation22_spill]] %s3734_s5 }
   0x6   :  { %3770 = sst [smem:[#allocation23_spill]] %s3735_s6 }
   0x7   :  { %3771 = sst [smem:[#allocation24_spill]] %s3736_s7 }
   0x8   :  { %3772 = sst [smem:[#allocation25_spill]] %s3744_s15 }
   0x9   :  { %3773 = sst [smem:[#allocation26_spill]] %s3745_s16 }
   0xa   :  { %3774 = sst [smem:[#allocation27_spill]] %s3746_s17 }
   0xb   :  { %3775 = sst [smem:[#allocation28_spill]] %s3747_s18 }
   0xc   :  { %3776 = sst [smem:[#allocation29_spill]] %s3748_s19 }
   0xd   :  { %24 = vsyncpa [#allocation4], 0 }
   0xe   :  { %26 = vsyncpa [#allocation4 + $0x1], 0  ;;  %s3187_s0 = smov 0   ;;  %s3189_s30 = smov 0  }
   0xf   :  { %s3191_s20 = smov 0   ;;  %s3193_s21 = smov 0  }
  0x10   :  { %s3195_s1 = smov 0   ;;  %s3197_s22 = smov 0  }
  0x11   :  { %s3199_s2 = smov 0   ;;  %s3201_s23 = smov 0  }
  0x12 LB: > { %3777 = sst [smem:[#allocation6_spill]] %s3054_s0  ;;  %s2390_s24 = sadd.s32 4294967295, %s3082_s23   ;;  %s3082_s23 = sphi %s3201_s23, %s32_s23   ;;  %s3078_s2 = sphi %s3199_s2, %s3824_s2   ;;  %s3074_s22 = sphi %s3197_s22, %s3823_s22   ;;  %s3070_s1 = sphi %s3195_s1, %s3822_s1   ;;  %s3066_s21 = sphi %s3193_s21, %s3827_s21   ;;  %s3062_s20 = sphi %s3191_s20, %s3820_s20   ;;  %s3058_s30 = sphi %s3189_s30, %s3826_s30   ;;  %s3054_s0 = sphi %s3187_s0, %s3825_s0  }
  0x13   : > { %3778 = sst [smem:[#allocation7_spill]] %s3062_s20  ;;  %s2391_s25 = sadd.s32 4294967294, %s3082_s23  }
  0x14   : > { %3779 = sst [smem:[#allocation8_spill]] %s3066_s21  ;;  %s41_s3 = sadd.s32 1, %s3074_s22 }
  0x15   : > { %3780 = sst [smem:[#allocation9_spill]] %s3070_s1  ;;  %p42_p0 = scmp.ge.s32.totalorder %s41_s3, 2 }
  0x16   : > { %3781 = sst [smem:[#allocation10_spill]] %s3074_s22  ;;  %s44_s26 = sadd.s32 1, %s3078_s2 }
  0x17   : > { %3782 = sst [smem:[#allocation11_spill]] %s3078_s2  ;;  %p525_p1 = scmp.ne.s32.totalorder %s3062_s20, %s3058_s30 }
  0x18   : > { %3783 = sst [smem:[#allocation12_spill]] %s3082_s23  ;;  %p526_p2 = scmp.eq.s32.totalorder %s2390_s24, 3 }
  0x19   : > { %s3829_s3 = smov (%p42_p0, %s41_s3), 0  ;;  %s3831_s26 = smov (!%p42_p0, %s44_s26), %s3078_s2 }
  0x1a   : > { %3784 = sst [smem:[#allocation13_spill]] %s3829_s3  ;;  %p3236_p3 = por %p526_p2, %p525_p1 }
  0x1b   : > { %p531_p4 = scmp.ne.s32.totalorder %s3058_s30, %s3054_s0  ;;  %p46_p5 = scmp.ge.s32.totalorder %s3831_s26, 2 }
  0x1c   : > { %s3785_s27 = scalar_select %p3236_p3, 1, 0 }
  0x1d   : > { %p532_p6 = scmp.eq.s32.totalorder %s2391_s25, 3  ;;  %p2394_p7 = scmp.ge.s32.totalorder %s3082_s23, 1 }
  0x1e   : > { %3786 = sst [smem:[#allocation14_spill]] %s3785_s27  ;;  %p658_p8 = scmp.lt.s32.totalorder %s3082_s23, 5 }
  0x1f   : > { %s3833_s26 = smov (%p46_p5, %s3831_s26), 0  ;;  %p3246_p9 = por %p532_p6, %p531_p4 }
  0x20   : > { %3787 = sst [smem:[#allocation15_spill]] %s3833_s26  ;;  %p659_p10 = pnand %p2394_p7, %p658_p8 }
  0x21   : > { %s3788_s28 = scalar_select %p3246_p9, 1, 0 }
  0x22   : > { %s512_s29 = ssub.s32 %s3078_s2, %s3833_s26  ;;  %s515_s24 = sadd.s32 1, %s3062_s20 }
  0x23   : > { %3789 = sst [smem:[#allocation16_spill]] %s3788_s28  ;;  %p513_p11 = scmp.eq.s32.totalorder %s512_s29, 0 }
  0x24   : > { %662 = sbr.rel (%p659_p10) target bundleno = 2353 (0x931), region = 96  ;;  %p759_p12 = scmp.lt.s32.totalorder (!%p659_p10), %s3070_s1, 1 }
  0x25   : > { %s3254_s3 = scalar_select %p513_p11, %s3062_s20, %s515_s24  }
  0x26   : > { %p764_p13 = scmp.lt.s32.totalorder (!%p659_p10), %s3066_s21, 1  ;;  %s3792_s19 = sld [smem:[#allocation18_spill]] (!%p659_p10) }
  0x27   : > { %3790 = sst [smem:[#allocation17_spill]] %s3254_s3 }
  0x28   : > { %s3793_s5 = sld [smem:[#allocation22_spill]] (!%p659_p10) }
  0x29   : > { %s760_s22 = scalar_select %p759_p12, %s3070_s1, 1 }
  0x2a   : > { %s3261_s0 = scalar_select %p764_p13, %s3066_s21, 1 }
  0x2b   : > { %s2853_s29 = smul.u32 48, %s760_s22  ;;  %s3794_s7 = sld [smem:[#allocation24_spill]] }
  0x2c   : > { %s2854_s18 = smul.u32 192, %s3261_s0  ;;  %s2758_s15 = sshll.u32 %s3261_s0, 6 }
  0x2d   : > { %s3274_s1 = scalar_lea.vmem %s3792_s19, %s2853_s29  ;;  %s2855_s16 = smul.u32 3, %s3261_s0 }
  0x2e   : > { %s3282_s21 = scalar_lea.vmem %s3793_s5, %s2854_s18  ;;  %s3795_s6 = sld [smem:[#allocation23_spill]] }
  0x2f   : > { %s2759_s2 = sshll.u32 %s3261_s0, 7  ;;  %s809_s22 = scalar_lea.vmem %s3743_s14, %s3261_s0 }
  0x30   : > { %s3311_s3 = scalar_lea.vmem %s3740_s11, %s2759_s2  ;;  %s3321_s28 = scalar_lea.vmem %s3742_s13, %s2759_s2 }
  0x31   : > { %s3287_s20 = scalar_lea.vmem %s3794_s7, %s2758_s15  ;;  %s2401_s15 = sshll.u32 %s3261_s0, 1 }
  0x32   : > { %s3316_s19 = scalar_lea.vmem %s3741_s12, %s2401_s15  ;;  %s3796_s5 = sand.u32 1, %s3058_s30  }
  0x33   : > { %s3329_s17 = scalar_lea.vmem [#allocation3], %s3796_s5  ;;  %s3797_s7 = sld [smem:[#allocation8_spill]] }
  0x34   : > { %s3292_s23 = scalar_lea.vmem %s3795_s6, %s2855_s16 }
  0x39   : > { %p2404_p0 = scmp.ne.s32.totalorder %s3797_s7, 0 }
  0x3a   : > { %s3798_s16 = sld [smem:[#allocation19_spill]] (!%p2404_p0) }
  0x3b   : > { %814 = sbr.rel (%p2404_p0) target bundleno = 237 (0xed), region = 100  ;;  %s3799_s29 = sld [smem:[#allocation20_spill]] (!%p2404_p0) }
  0x40   : > { %v2768_v0 = vld [vmem:[%s3798_s16 + $0x38] sm:$0xff]  ;;  %v2767_v2 = vld [vmem:[%s3798_s16 + $0x30] sm:$0xff]  ;;  %v2766_v4 = vld [vmem:[%s3798_s16 + $0x28] sm:$0xff]  ;;  %vm924_vm0 = vcmask 523264  }
  0x41   : > { %v2772_v1 = vld [vmem:[%s3798_s16 + $0x58] sm:$0xff]  ;;  %931 = vmatpush.bf16.msra.mxu0 %v2768_v0  ;;  %2845 = vmatpush.bf16.msra.mxu2 %v2768_v0  ;;  %v2771_v3 = vld [vmem:[%s3798_s16 + $0x50] sm:$0xff]  ;;  %v2770_v5 = vld [vmem:[%s3798_s16 + $0x48] sm:$0xff] }
  0x42   : > { %953 = vmatpush.bf16.msra.mxu1 %v2772_v1  ;;  %v2765_v6 = vld [vmem:[%s3798_s16 + $0x20] sm:$0xff]  ;;  %v816_v8 = vld [vmem:[%s3274_s1 + $0x8] sm:$0xff]  ;;  %v818_v9 = vld [vmem:[%s3274_s1 + $0x18] sm:$0xff] }
  0x43   : > { %v2769_v7 = vld [vmem:[%s3798_s16 + $0x40] sm:$0xff]  ;;  %v822_v10 = vpack.c.bf16 %v818_v9, %v816_v8  ;;  %v2764_v11 = vld [vmem:[%s3798_s16 + $0x18] sm:$0xff]  ;;  %v2763_v12 = vld [vmem:[%s3798_s16 + $0x10] sm:$0xff] }
  0x44   : > { %v2762_v13 = vld [vmem:[%s3798_s16 + $0x8] sm:$0xff]  ;;  %v2761_v14 = vld [vmem:[%s3798_s16] sm:$0xff]  ;;  %v817_v16 = vld [vmem:[%s3274_s1 + $0x10] sm:$0xff] }
  0x45   : > { %932 = vmatpush.bf16.msra.mxu0 %v2767_v2  ;;  %2846 = vmatpush.bf16.msra.mxu2 %v2767_v2  ;;  %v815_v15 = vld [vmem:[%s3274_s1] sm:$0xff]  ;;  %v820_v18 = vld [vmem:[%s3274_s1 + $0x28] sm:$0x1]  ;;  %v851_v29 = vld [vmem:[%s3799_s29 + $0x10] sm:$0x1] }
  0x46   : > { %954 = vmatpush.bf16.msra.mxu1 %v2771_v3  ;;  %v819_v17 = vld [vmem:[%s3274_s1 + $0x20] sm:$0x1]  ;;  %v821_v19 = vpack.c.bf16 %v817_v16, %v815_v15  ;;  %v824_v21 = vpack.c.bf16 %v820_v18, %v820_v18  ;;  %v850_v30 = vld [vmem:[%s3799_s29 + $0x8] sm:$0xff] }
  0x47   : > { %v823_v20 = vpack.c.bf16 %v819_v17, %v819_v17  ;;  %v849_v24 = vld [vmem:[%s3799_s29] sm:$0xff] }
  0x49   : > { %933 = vmatpush.bf16.msra.mxu0 %v2766_v4  ;;  %2847 = vmatpush.bf16.msra.mxu2 %v2766_v4 }
  0x4a   : > { %955 = vmatpush.bf16.msra.mxu1 %v2770_v5 }
  0x4d   : > { %934 = vmatpush.bf16.msra.mxu0 %v2765_v6  ;;  %2848 = vmatpush.bf16.msra.mxu2 %v2765_v6 }
  0x4e   : > { %956 = vmatpush.bf16.msra.mxu1 %v2769_v7 }
  0x51   : > { %2453 = vmatmul.msk.bf16.vlgmr.msra.gmra.mxu1 %vm924_vm0, %v822_v10  ;;  %935 = vmatpush.bf16.msra.mxu0 %v2764_v11 }
  0x52   : > { %2849 = vmatpush.bf16.msra.mxu2 %v2764_v11 }
  0x55   : > { %936 = vmatpush.bf16.msra.mxu0 %v2763_v12 }
  0x56   : > { %2850 = vmatpush.bf16.msra.mxu2 %v2763_v12 }
  0x59   : > { %937 = vmatpush.bf16.msra.mxu0 %v2762_v13 }
  0x5a   : > { %2851 = vmatpush.bf16.msra.mxu2 %v2762_v13 }
  0x5d   : > { %938 = vmatpush.bf16.msra.mxu0 %v2761_v14 }
  0x5e   : > { %2852 = vmatpush.bf16.msra.mxu2 %v2761_v14 }
  0x60   : > { %939 = vmatmul.bf16.vlgmr.msra.gmra.mxu0 %v821_v19 }
  0x61   : > { %944 = vmatmul.bf16.vlgmr.msra.gmra.mxu2 %v823_v20  ;;  %2454 = vmatmul.msk.bf16.gmra.mxu1 %vm924_vm0, %v824_v21 }
  0xce   : > { %v958_v22 = vpop.f32.mrf.mxu1 }
  0xd6   : > { %v960_v23 = vpop.f32.mrf.mxu1 }
  0xdd   : > { %v940_v25 = vpop.f32.mrf.mxu0 }
  0xde   : > { %v941_v26 = vadd.f32 %v940_v25, %v849_v24  ;;  %v963_v27 = vpop.f32.mrf.mxu1 }
  0xe0   : > { %v959_v28 = vadd.f32 %v958_v22, %v941_v26 }
  0xe2   : > { %967 = vst [vmem:[#allocation2 + $0x10] sm:$0xff] %v959_v28 }
  0xe4   : > { %v945_v31 = vpop.f32.mrf.mxu2 }
  0xe5   : > { %v946_v32 = vadd.f32 %v945_v31, %v851_v29  ;;  %v942_v33 = vpop.f32.mrf.mxu0 }
  0xe6   : > { %v943_v34 = vadd.f32 %v942_v33, %v850_v30  ;;  %v965_v35 = vpop.f32.mrf.mxu1 }
  0xe7   : > { %v964_v36 = vadd.f32 %v963_v27, %v946_v32 }
  0xe8   : > { %v961_v37 = vadd.f32 %v960_v23, %v943_v34 }
  0xe9   : > { %969 = vst [vmem:[#allocation2 + $0x8] sm:$0x1] %v964_v36 }
  0xea   : > { %968 = vst [vmem:[#allocation2] sm:$0xff] %v961_v37 }
  0xec   : > { %v947_v38 = vpop.f32.mrf.mxu2 }
  0xed PF: > { %v3385_v39 = vld [vmem:[#allocation2 + $0x10] sm:$0xff]  ;;  %vm979_vm1 = vcmask 1040384   ;;  %v3084_v43 = vmov 128.0   ;;  %v2541_v63 = vld [vmem:[%s3282_s21 + $0xa8] sm:$0xf]  ;;  %s3800_s25 = sld [smem:[#allocation21_spill]]  ;;  %s3802_s15 = scalar_lea.vmem %s3733_s4, %s3261_s0 }
  0xee   : > { %975 = vadd.xlane.f32.xlu0 %v3385_v39  ;;  %2936 = vrcp.f32 %v3084_v43  ;;  %v2795_v0 = vld [vmem:[%s3282_s21 + $0xb0] sm:$0xf0]  ;;  %v2794_v1 = vld [vmem:[%s3282_s21 + $0xac] sm:$0xf]  ;;  %v2543_v3 = vld [vmem:[%s3282_s21 + $0xb4] sm:$0xf0]  ;;  %s3803_s1 = scalar_lea.vmem %s3737_s8, %s3261_s0  ;;  %s3804_s5 = scalar_lea.vmem %s3738_s9, %s3261_s0 }
  0xef   : > { %v2542_v2 = vor.u32 %v2795_v0, %v2541_v63  ;;  %v2549_v4 = vld [vmem:[%s3282_s21 + $0xb0] sm:$0xf]  ;;  %v2796_v5 = vld [vmem:[%s3282_s21 + $0xb8] sm:$0xf0]  ;;  %v2546_v6 = vor.u32 %v2794_v1, %v2543_v3  ;;  %v2791_v10 = vld [vmem:[%s3282_s21 + $0x94] sm:$0xf]  ;;  %s3805_s6 = scalar_lea.vmem %s3739_s10, %s3261_s0 }
  0xf0   : > { %v3387_v40 = vld [vmem:[#allocation2 + $0x8] sm:$0x1]  ;;  %v2550_v7 = vor.u32 %v2796_v5, %v2549_v4  ;;  %v2529_v8 = vld [vmem:[%s3282_s21 + $0x90] sm:$0xf]  ;;  %v2792_v9 = vld [vmem:[%s3282_s21 + $0x98] sm:$0xf0] }
  0xf1   : > { %v980_v41 = vsel %vm979_vm1, %v3387_v40, 0.0  ;;  %v3392_v42 = vld [vmem:[#allocation2] sm:$0xff]  ;;  %1227 = vmatpush.bf16.msra.mxu0 %v2542_v2  ;;  %1245 = vmatpush.bf16.msra.mxu1 %v2546_v6  ;;  %v2530_v11 = vor.u32 %v2792_v9, %v2529_v8  ;;  %v2537_v13 = vld [vmem:[%s3282_s21 + $0x98] sm:$0xf]  ;;  %v2788_v19 = vld [vmem:[%s3282_s21 + $0x7c] sm:$0xf] }
  0xf2   : > { %981 = vadd.xlane.f32.xlu1 %v980_v41  ;;  %1263 = vmatpush.bf16.msra.mxu2 %v2550_v7  ;;  %v2531_v12 = vld [vmem:[%s3282_s21 + $0x9c] sm:$0xf0]  ;;  %v2793_v14 = vld [vmem:[%s3282_s21 + $0xa0] sm:$0xf0]  ;;  %v2517_v17 = vld [vmem:[%s3282_s21 + $0x78] sm:$0xf] }
  0xf3   : > { %v2534_v15 = vor.u32 %v2791_v10, %v2531_v12  ;;  %v2538_v16 = vor.u32 %v2793_v14, %v2537_v13  ;;  %v2789_v18 = vld [vmem:[%s3282_s21 + $0x80] sm:$0xf0]  ;;  %v2519_v21 = vld [vmem:[%s3282_s21 + $0x84] sm:$0xf0]  ;;  %v2525_v22 = vld [vmem:[%s3282_s21 + $0x80] sm:$0xf]  ;;  %s3801_s18 = scalar_lea.vmem %s3800_s25, %s3261_s0 }
  0xf4   : > { %v2937_v44 = vpop.eup %2936  ;;  %v2518_v20 = vor.u32 %v2789_v18, %v2517_v17  ;;  %v2790_v23 = vld [vmem:[%s3282_s21 + $0x88] sm:$0xf0]  ;;  %v2522_v24 = vor.u32 %v2788_v19, %v2519_v21  ;;  %v2505_v26 = vld [vmem:[%s3282_s21 + $0x60] sm:$0xf]  ;;  %v2785_v28 = vld [vmem:[%s3282_s21 + $0x64] sm:$0xf] }
  0xf5   : > { %v984_v45 = vmul.f32 128.0, %v2937_v44  ;;  %vm988_vm2 = vweird.f32 %v2937_v44  ;;  %1228 = vmatpush.bf16.msra.mxu0 %v2530_v11  ;;  %1246 = vmatpush.bf16.msra.mxu1 %v2534_v15  ;;  %v2526_v25 = vor.u32 %v2790_v23, %v2525_v22  ;;  %v2786_v27 = vld [vmem:[%s3282_s21 + $0x68] sm:$0xf0]  ;;  %v2507_v30 = vld [vmem:[%s3282_s21 + $0x6c] sm:$0xf0]  ;;  %s3085_s24 = smov 64  }
  0xf6   : > { %977 = vadd.xlane.f32.xlu0 %v3392_v42  ;;  %1264 = vmatpush.bf16.msra.mxu2 %v2538_v16  ;;  %v2506_v29 = vor.u32 %v2786_v27, %v2505_v26  ;;  %v2513_v31 = vld [vmem:[%s3282_s21 + $0x68] sm:$0xf]  ;;  %v2787_v32 = vld [vmem:[%s3282_s21 + $0x70] sm:$0xf0]  ;;  %v2510_v33 = vor.u32 %v2785_v28, %v2507_v30  ;;  %v2782_v37 = vld [vmem:[%s3282_s21 + $0x4c] sm:$0xf] }
  0xf7   : > { %v985_v46 = vsub.f32 1.0, %v984_v45  ;;  %v2514_v34 = vor.u32 %v2787_v32, %v2513_v31  ;;  %v2493_v35 = vld [vmem:[%s3282_s21 + $0x48] sm:$0xf]  ;;  %v2783_v36 = vld [vmem:[%s3282_s21 + $0x50] sm:$0xf0]  ;;  %vm1301_vm12 = vcmask 523264  }
  0xf8   : > { %v2494_v38 = vor.u32 %v2783_v36, %v2493_v35  ;;  %v2495_v41 = vld [vmem:[%s3282_s21 + $0x54] sm:$0xf0]  ;;  %v2501_v43 = vld [vmem:[%s3282_s21 + $0x50] sm:$0xf]  ;;  %v2471_v0 = vld [vmem:[%s3282_s21 + $0x24] sm:$0xf0] }
  0xf9   : > { %v986_v47 = vmul.f32 %v2937_v44, %v985_v46  ;;  %1229 = vmatpush.bf16.msra.mxu0 %v2518_v20  ;;  %1247 = vmatpush.bf16.msra.mxu1 %v2522_v24  ;;  %v2498_v45 = vor.u32 %v2782_v37, %v2495_v41  ;;  %v2477_v1 = vld [vmem:[%s3282_s21 + $0x20] sm:$0xf]  ;;  %v2778_v2 = vld [vmem:[%s3282_s21 + $0x28] sm:$0xf0]  ;;  %v2773_v9 = vld [vmem:[%s3282_s21 + $0x4] sm:$0xf] }
  0xfa   : > { %1265 = vmatpush.bf16.msra.mxu2 %v2526_v25  ;;  %v2478_v4 = vor.u32 %v2778_v2, %v2477_v1  ;;  %v2457_v7 = vld [vmem:[%s3282_s21] sm:$0xf]  ;;  %v2774_v8 = vld [vmem:[%s3282_s21 + $0x8] sm:$0xf0]  ;;  %v2459_v11 = vld [vmem:[%s3282_s21 + $0xc] sm:$0xf0] }
  0xfb   : > { %v987_v48 = vadd.f32 %v2937_v44, %v986_v47  ;;  %v2481_v47 = vld [vmem:[%s3282_s21 + $0x30] sm:$0xf]  ;;  %v2458_v10 = vor.u32 %v2774_v8, %v2457_v7  ;;  %v2465_v12 = vld [vmem:[%s3282_s21 + $0x8] sm:$0xf]  ;;  %v2775_v13 = vld [vmem:[%s3282_s21 + $0x10] sm:$0xf0]  ;;  %v2462_v15 = vor.u32 %v2773_v9, %v2459_v11 }
  0xfc   : > { %v2466_v16 = vor.u32 %v2775_v13, %v2465_v12  ;;  %v2930_v37 = vld [vmem:[%s3801_s18] ss:$0 sm:$0xff]  ;;  %vm1335_vm13 = vcmask 138240   ;;  %vm1342_vm14 = vcmask 131072   ;;  %s3806_s0 = sld [smem:[#allocation8_spill]] }
  0xfd   : > { %v3395_v49 = vsel %vm988_vm2, %v2937_v44, %v987_v48  ;;  %1230 = vmatpush.bf16.msra.mxu0 %v2506_v29  ;;  %1248 = vmatpush.bf16.msra.mxu1 %v2510_v33  ;;  %v2784_v44 = vld [vmem:[%s3282_s21 + $0x58] sm:$0xf0] }
  0xfe   : > { %1266 = vmatpush.bf16.msra.mxu2 %v2514_v34  ;;  %v2502_v46 = vor.u32 %v2784_v44, %v2501_v43  ;;  %v2780_v48 = vld [vmem:[%s3282_s21 + $0x38] sm:$0xf0] }
 0x101   : > { %1231 = vmatpush.bf16.msra.mxu0 %v2494_v38  ;;  %1249 = vmatpush.bf16.msra.mxu1 %v2498_v45 }
 0x102   : > { %1267 = vmatpush.bf16.msra.mxu2 %v2502_v46  ;;  %p2723_p1 = scmp.ne.s32.totalorder %s3806_s0, 1 }
 0x103   : > { %s3807_s18 = sld [smem:[#allocation27_spill]] (!%p2723_p1) }
 0x104   : > { %s3809_s26 = sld [smem:[#allocation26_spill]] (!%p2723_p1) }
 0x161   : > { %v976_v50 = vpop.xlane.xlu0 %975 }
 0x162   : > { %v990_v51 = vmul.f32 %v3395_v49, %v976_v50  ;;  %v2779_v50 = vld [vmem:[%s3282_s21 + $0x34] sm:$0xf] }
 0x164   : > { %v3399_v52 = vsub.f32 %v3385_v39, %v990_v51  ;;  %v2482_v51 = vor.u32 %v2780_v48, %v2481_v47  ;;  %v2931_v47 = vld [vmem:[%s3802_s15] ss:$0 sm:$0xff] }
 0x165   : > { %v982_v54 = vpop.xlane.xlu1 %981 }
 0x166   : > { %v996_v53 = vmul.f32 %v3399_v52, %v3399_v52  ;;  %v992_v56 = vmul.f32 %v3395_v49, %v982_v54  ;;  %v2489_v54 = vld [vmem:[%s3282_s21 + $0x38] sm:$0xf]  ;;  %1232 = vmatpush.bf16.msra.mxu0 %v2482_v51 }
 0x168   : > { %999 = vadd.xlane.f32.xlu1 %v996_v53  ;;  %v3409_v59 = vsub.f32 %v3387_v40, %v992_v56  ;;  %v2483_v53 = vld [vmem:[%s3282_s21 + $0x3c] sm:$0xf0] }
 0x169   : > { %v978_v55 = vpop.xlane.xlu0 %977  ;;  %v2486_v56 = vor.u32 %v2779_v50, %v2483_v53 }
 0x16a   : > { %v991_v57 = vmul.f32 %v3395_v49, %v978_v55  ;;  %v998_v61 = vmul.f32 %v3409_v59, %v3409_v59  ;;  %v2781_v55 = vld [vmem:[%s3282_s21 + $0x40] sm:$0xf0] }
 0x16b   : > { %1250 = vmatpush.bf16.msra.mxu1 %v2486_v56 }
 0x16c   : > { %v3406_v58 = vsub.f32 %v3392_v42, %v991_v57  ;;  %v1003_v62 = vsel %vm979_vm1, %v998_v61, 0.0  ;;  %v2490_v57 = vor.u32 %v2781_v55, %v2489_v54  ;;  %v2777_v61 = vld [vmem:[%s3282_s21 + $0x20] sm:$0xf0] }
 0x16e   : > { %v997_v60 = vmul.f32 %v3406_v58, %v3406_v58  ;;  %1268 = vmatpush.bf16.msra.mxu2 %v2490_v57 }
 0x170   : > { %1001 = vadd.xlane.f32.xlu2 %v997_v60  ;;  %v2469_v60 = vld [vmem:[%s3282_s21 + $0x18] sm:$0xf] }
 0x171   : > { %v2470_v63 = vor.u32 %v2777_v61, %v2469_v60 }
 0x172   : > { %1269 = vmatpush.bf16.msra.mxu2 %v2478_v4 }
 0x173   : > { %1233 = vmatpush.bf16.msra.mxu0 %v2470_v63 }
 0x176   : > { %1270 = vmatpush.bf16.msra.mxu2 %v2466_v16 }
 0x177   : > { %1234 = vmatpush.bf16.msra.mxu0 %v2458_v10 }
 0x178   : > { %1004 = vadd.xlane.f32.xlu2 %v1003_v62  ;;  %v2776_v62 = vld [vmem:[%s3282_s21 + $0x1c] sm:$0xf] }
 0x179   : > { %v2474_v3 = vor.u32 %v2776_v62, %v2471_v0  ;;  %v1091_v0 = vld [vmem:[%s3292_s23] sm:$0x7] }
 0x17a   : > { %v1093_v1 = vperm.slane %v1091_v0, 0  ;;  %v1094_v2 = vperm.slane %v1091_v0, 1 }
 0x17b   : > { %1251 = vmatpush.bf16.msra.mxu1 %v2474_v3 }
 0x17f   : > { %1252 = vmatpush.bf16.msra.mxu1 %v2462_v15 }
 0x1db   : > { %v1000_v5 = vpop.xlane.xlu1 %999 }
 0x1dc   : > { %v1006_v6 = vmul.f32 %v1000_v5, %v3395_v49 }
 0x1de   : > { %v1009_v14 = vadd.f32 1e-12, %v1006_v6 }
 0x1e0   : > { %2938 = vrsqrt.f32 %v1009_v14  ;;  %vm1018_vm4 = vweird.f32 %v1009_v14 }
 0x1e3   : > { %v1002_v17 = vpop.xlane.xlu2 %1001 }
 0x1e4   : > { %v1007_v18 = vmul.f32 %v1002_v17, %v3395_v49  ;;  %v1095_v17 = vperm.slane %v1091_v0, 2 }
 0x1e6   : > { %v2939_v19 = vpop.eup %2938  ;;  %v1010_v20 = vadd.f32 1e-12, %v1007_v18 }
 0x1e7   : > { %v1013_v21 = vmul.f32 %v2939_v19, %v1009_v14  ;;  %vm1019_vm3 = vweird.f32 %v2939_v19 }
 0x1e8   : > { %2940 = vrsqrt.f32 %v1010_v20  ;;  %vm1020_vm5 = vmor %vm1018_vm4, %vm1019_vm3  ;;  %vm1028_vm7 = vweird.f32 %v1010_v20 }
 0x1e9   : > { %v1014_v22 = vmul.f32 %v2939_v19, %v1013_v21 }
 0x1eb   : > { %v1015_v23 = vmul.f32 0.5, %v1014_v22  ;;  %v1005_v24 = vpop.xlane.xlu2 %1004 }
 0x1ec   : > { %v1008_v25 = vmul.f32 %v1005_v24, %v3395_v49  ;;  %v3086_v24 = vmov 0  }
 0x1ed   : > { %v1016_v26 = vsub.f32 1.5, %v1015_v23 }
 0x1ee   : > { %v2941_v27 = vpop.eup %2940  ;;  %v1011_v28 = vadd.f32 1e-12, %v1008_v25  ;;  %v3486_v25 = vsel %vm979_vm1, 65535, %v3086_v24 }
 0x1ef   : > { %v1017_v29 = vmul.f32 %v2939_v19, %v1016_v26  ;;  %v1023_v30 = vmul.f32 %v2941_v27, %v1010_v20  ;;  %vm1029_vm6 = vweird.f32 %v2941_v27 }
 0x1f0   : > { %2942 = vrsqrt.f32 %v1011_v28  ;;  %vm1030_vm8 = vmor %vm1028_vm7, %vm1029_vm6  ;;  %vm1038_vm9 = vweird.f32 %v1011_v28 }
 0x1f1   : > { %v1024_v31 = vmul.f32 %v2941_v27, %v1023_v30  ;;  %v1021_v32 = vsel %vm1020_vm5, %v2939_v19, %v1017_v29 }
 0x1f2   : > { %v1042_v36 = vmul.f32 %v1021_v32, %v3399_v52 }
 0x1f3   : > { %v1025_v33 = vmul.f32 0.5, %v1024_v31 }
 0x1f4   : > { %v1048_v46 = vmul.f32 %v2930_v37, %v1042_v36 }
 0x1f5   : > { %v1026_v34 = vsub.f32 1.5, %v1025_v33 }
 0x1f6   : > { %v2943_v35 = vpop.eup %2942  ;;  %v1054_v51 = vadd.f32 %v2931_v47, %v1048_v46 }
 0x1f7   : > { %v1027_v38 = vmul.f32 %v2941_v27, %v1026_v34  ;;  %v1033_v41 = vmul.f32 %v2943_v35, %v1011_v28  ;;  %vm1039_vm10 = vweird.f32 %v2943_v35 }
 0x1f8   : > { %vm1040_vm11 = vmor %vm1038_vm9, %vm1039_vm10 }
 0x1f9   : > { %v1031_v43 = vsel %vm1030_vm8, %v2941_v27, %v1027_v38  ;;  %v1034_v44 = vmul.f32 %v2943_v35, %v1033_v41 }
 0x1fa   : > { %v1043_v45 = vmul.f32 %v1031_v43, %v3406_v58 }
 0x1fb   : > { %v1035_v52 = vmul.f32 0.5, %v1034_v44 }
 0x1fc   : > { %v1049_v48 = vmul.f32 %v2930_v37, %v1043_v45 }
 0x1fd   : > { %v1036_v50 = vsub.f32 1.5, %v1035_v52 }
 0x1fe   : > { %v1055_v53 = vadd.f32 %v2931_v47, %v1049_v48 }
 0x1ff   : > { %v1037_v54 = vmul.f32 %v2943_v35, %v1036_v50 }
 0x200   : > { %v1057_v55 = vpack.c.bf16 %v1055_v53, %v1054_v51 }
 0x201   : > { %v1041_v56 = vsel %vm1040_vm11, %v2943_v35, %v1037_v54 }
 0x202   : > { %1235 = vmatmul.bf16.vlgmr.msra.gmra.mxu0 %v1057_v55  ;;  %1253 = vmatmul.bf16.vlgmr.msra.gmra.mxu1 %v1057_v55  ;;  %v1044_v58 = vmul.f32 %v1041_v56, %v3409_v59 }
 0x203   : > { %1271 = vmatmul.bf16.vlgmr.msra.gmra.mxu2 %v1057_v55 }
 0x204   : > { %v1050_v57 = vmul.f32 %v2930_v37, %v1044_v58 }
 0x206   : > { %v1056_v60 = vadd.f32 %v2931_v47, %v1050_v57 }
 0x208   : > { %v1058_v61 = vpack.c.bf16 %v1056_v60, %v1056_v60 }
 0x212   : > { %1240 = vmatmul.bf16.gmra.mxu0 %v1058_v61  ;;  %1258 = vmatmul.bf16.gmra.mxu1 %v1058_v61 }
 0x213   : > { %1276 = vmatmul.bf16.gmra.mxu2 %v1058_v61 }
 0x27f   : > { %v1236_v62 = vpop.f32.mrf.mxu0  ;;  %v1254_v63 = vpop.f32.mrf.mxu1 }
 0x280   : > { %v1237_v6 = vadd.f32 %v1236_v62, %v1093_v1  ;;  %v1255_v7 = vadd.f32 %v1254_v63, %v1094_v2 }
 0x286   : > { %v1272_v3 = vpop.f32.mrf.mxu2 }
 0x287   : > { %v1238_v4 = vpop.f32.mrf.mxu0  ;;  %v1256_v5 = vpop.f32.mrf.mxu1  ;;  %v1273_v30 = vadd.f32 %v1272_v3, %v1095_v17 }
 0x288   : > { %v1239_v8 = vadd.f32 %v1238_v4, %v1093_v1  ;;  %v1257_v9 = vadd.f32 %v1256_v5, %v1094_v2 }
 0x28a   : > { %v1297_v10 = vpack.c.bf16 %v1239_v8, %v1237_v6  ;;  %v1299_v59 = vpack.c.bf16 %v1257_v9, %v1255_v7 }
 0x28c   : > { %1413 = vrot.lane.b32.xlu1 %v1299_v59, %s3085_s24  ;;  %1407 = vrot.lane.b32.xlu2 %v1297_v10, %s3085_s24  ;;  %v1309_v28 = vsel %vm1301_vm12, %v1299_v59, 0 }
 0x28e   : > { %v1274_v11 = vpop.f32.mrf.mxu2 }
 0x28f   : > { %v1241_v12 = vpop.f32.mrf.mxu0  ;;  %v1259_v13 = vpop.f32.mrf.mxu1  ;;  %v1275_v27 = vadd.f32 %v1274_v11, %v1095_v17 }
 0x290   : > { %v1260_v14 = vadd.f32 %v1259_v13, %v1094_v2  ;;  %v1242_v18 = vadd.f32 %v1241_v12, %v1093_v1 }
 0x291   : > { %v1369_v32 = vpack.c.bf16 %v1275_v27, %v1273_v30  ;;  %v2800_v27 = vld [vmem:[%s3287_s20 + $0x18] sm:$0xff] }
 0x292   : > { %v1300_v15 = vpack.c.bf16 %v1260_v14, %v1260_v14  ;;  %v1298_v26 = vpack.c.bf16 %v1242_v18, %v1242_v18 }
 0x294   : > { %1415 = vrot.lane.b32.xlu0 %v1300_v15, %s3085_s24  ;;  %v1312_v16 = vsel %vm1301_vm12, %v1300_v15, 0 }
 0x295   : > { %1320 = vmatpush.bf16.xpose.msra.mxu3 %v1312_v16 }
 0x296   : > { %v1277_v19 = vpop.f32.mrf.mxu2 }
 0x297   : > { %v1278_v20 = vadd.f32 %v1277_v19, %v1095_v17  ;;  %v1243_v21 = vpop.f32.mrf.mxu0  ;;  %v1261_v22 = vpop.f32.mrf.mxu1 }
 0x299   : > { %v1370_v23 = vpack.c.bf16 %v1278_v20, %v1278_v20 }
 0x29b   : > { %v1380_v29 = vand.u32 %v3486_v25, %v1370_v23 }
 0x29c   : > { %1409 = vrot.lane.b32.xlu0 %v1298_v26, %s3085_s24 }
 0x29d   : > { %1321 = vmatpush.bf16.xpose.msra.mxu3 %v1309_v28 }
 0x29e   : > { %v1279_v31 = vpop.f32.mrf.mxu2 }
 0x2a4   : > { %2551 = vmatmul.msk.bf16.vlgmr.msra.gmra.mxu3 %vm1301_vm12, %v1297_v10 }
 0x2a5   : > { %1388 = vmatpush.bf16.msrb.mxu3 %v1380_v29 }
 0x2a9   : > { %1389 = vmatpush.bf16.msrb.mxu3 %v1369_v32 }
 0x2ad   : > { %1603 = vmatpush.bf16.msra.mxu3 %v2800_v27 }
 0x2b4   : > { %2552 = vmatmul.msk.bf16.gmra.mxu3 %vm1301_vm12, %v1298_v26 }
 0x2e6   : > { %v1408_v37 = vpop.permute.xlu2 %1407 }
 0x2fe   : > { %v1414_v35 = vpop.permute.xlu1 %1413 }
 0x2ff   : > { %v1424_v36 = vsel %vm1301_vm12, %v1414_v35, 0  ;;  %v2798_v35 = vld [vmem:[%s3287_s20 + $0x8] sm:$0xff] }
 0x306   : > { %v1416_v33 = vpop.permute.xlu0 %1415 }
 0x307   : > { %v1427_v34 = vsel %vm1301_vm12, %v1416_v33, 0 }
 0x308   : > { %1435 = vmatpush.bf16.xpose.msrb.mxu0 %v1427_v34  ;;  %v2799_v34 = vld [vmem:[%s3287_s20 + $0x10] sm:$0xff] }
 0x309   : > { %1604 = vmatpush.bf16.msra.mxu3 %v2799_v34 }
 0x30d   : > { %1605 = vmatpush.bf16.msra.mxu3 %v2798_v35 }
 0x30e   : > { %v1410_v38 = vpop.permute.xlu0 %1409 }
 0x310   : > { %1436 = vmatpush.bf16.xpose.msrb.mxu0 %v1424_v36 }
 0x317   : > { %2555 = vmatmul.msk.bf16.vlgmr.msrb.gmra.mxu0 %vm1301_vm12, %v1408_v37 }
 0x327   : > { %v1323_v41 = vpop.f32.mrf.mxu3  ;;  %2556 = vmatmul.msk.bf16.gmra.mxu0 %vm1301_vm12, %v1410_v38 }
 0x328   : > { %v1332_v43 = vmul.f32 0.125, %v1323_v41  ;;  %v2797_v41 = vld [vmem:[%s3287_s20] sm:$0xff] }
 0x329   : > { %1606 = vmatpush.bf16.msra.mxu3 %v2797_v41 }
 0x32a   : > { %v1336_v44 = vsel %vm1335_vm13, %v1332_v43, -inf }
 0x32b   : > { %1337 = vmax.xlane.f32.xlu2 %v1336_v44 }
 0x32f   : > { %v1325_v45 = vpop.f32.mrf.mxu3 }
 0x330   : > { %v1333_v46 = vmul.f32 0.125, %v1325_v45 }
 0x332   : > { %v1339_v47 = vsel %vm1335_vm13, %v1333_v46, -inf }
 0x333   : > { %1340 = vmax.xlane.f32.xlu1 %v1339_v47 }
 0x337   : > { %v1328_v52 = vpop.f32.mrf.mxu3 }
 0x338   : > { %v1334_v60 = vmul.f32 0.125, %v1328_v52 }
 0x33a   : > { %v1343_v1 = vsel %vm1342_vm14, %v1334_v60, -inf }
 0x33f   : > { %v1330_v48 = vpop.f32.mrf.mxu3 }
 0x34c   : > { %1486 = vrot.lane.b32.xlu1 %v1370_v23, %s3085_s24 }
 0x394   : > { %v1438_v50 = vpop.f32.mrf.mxu0 }
 0x395   : > { %v1447_v51 = vmul.f32 0.125, %v1438_v50 }
 0x397   : > { %v1450_v53 = vsel %vm1335_vm13, %v1447_v51, -inf }
 0x398   : > { %1451 = vmax.xlane.f32.xlu0 %v1450_v53  ;;  %v2804_v53 = vld [vmem:[%s3287_s20 + $0x38] sm:$0xff] }
 0x399   : > { %1555 = vmatpush.bf16.msrb.mxu2 %v2804_v53  ;;  %v2645_v53 = vld [vmem:[%s3311_s3 + $0x60] sm:$0xf] }
 0x39c   : > { %v1440_v54 = vpop.f32.mrf.mxu0 }
 0x39d   : > { %v1448_v55 = vmul.f32 0.125, %v1440_v54  ;;  %v2803_v54 = vld [vmem:[%s3287_s20 + $0x30] sm:$0xff] }
 0x39e   : > { %v1338_v56 = vpop.xlane.xlu2 %1337  ;;  %1556 = vmatpush.bf16.msrb.mxu2 %v2803_v54  ;;  %v2818_v54 = vld [vmem:[%s3311_s3 + $0x64] sm:$0xf0] }
 0x39f   : > { %v1453_v58 = vsel %vm1335_vm13, %v1448_v55, -inf  ;;  %v1346_v57 = vsub.f32 %v1332_v43, %v1338_v56  ;;  %v2801_v56 = vld [vmem:[%s3287_s20 + $0x20] sm:$0xff] }
 0x3a0   : > { %1454 = vmax.xlane.f32.xlu2 %v1453_v58 }
 0x3a1   : > { %v1349_v62 = vmul.f32 1.442695, %v1346_v57 }
 0x3a3   : > { %2944 = vpow2.f32 %v1349_v62 }
 0x3a4   : > { %v1443_v61 = vpop.f32.mrf.mxu0 }
 0x3a5   : > { %v1449_v3 = vmul.f32 0.125, %v1443_v61 }
 0x3a6   : > { %v1341_v63 = vpop.xlane.xlu1 %1340 }
 0x3a7   : > { %v1347_v0 = vsub.f32 %v1333_v46, %v1341_v63  ;;  %v1456_v5 = vsel %vm1342_vm14, %v1449_v3, -inf }
 0x3a8   : > { %1344 = vmax.xlane.f32.xlu2 %v1343_v1 }
 0x3a9   : > { %v1351_v2 = vmul.f32 1.442695, %v1347_v0  ;;  %v2945_v6 = vpop.eup %2944 }
 0x3aa   : > { %v1355_v9 = vsel %vm1335_vm13, %v2945_v6, 0.0 }
 0x3ab   : > { %2946 = vpow2.f32 %v1351_v2 }
 0x3ac   : > { %1484 = vrot.lane.b32.xlu0 %v1369_v32, %s3085_s24  ;;  %v1445_v4 = vpop.f32.mrf.mxu0 }
 0x3b0   : > { %1457 = vmax.xlane.f32.xlu2 %v1456_v5 }
 0x3b1   : > { %v2947_v7 = vpop.eup %2946 }
 0x3b2   : > { %v1367_v8 = vpack.c.bf16 %v2947_v7, %v2945_v6  ;;  %v1358_v11 = vsel %vm1335_vm13, %v2947_v7, 0.0 }
 0x3b4   : > { %2553 = vmatmul.msk.bf16.vlgmr.msrb.gmra.mxu3 %vm1335_vm13, %v1367_v8 }
 0x3b8   : > { %1356 = vadd.xlane.f32.xlu2 %v1355_v9 }
 0x3be   : > { %v1487_v10 = vpop.permute.xlu1 %1486 }
 0x3bf   : > { %v1496_v59 = vand.u32 %v1487_v10, %v3486_v25 }
 0x3c1   : > { %1504 = vmatpush.bf16.msrb.mxu1 %v1496_v59 }
 0x3d6   : > { %1359 = vadd.xlane.f32.xlu0 %v1358_v11 }
 0x40b   : > { %v1452_v12 = vpop.xlane.xlu0 %1451 }
 0x40c   : > { %v1459_v13 = vsub.f32 %v1447_v51, %v1452_v12 }
 0x40e   : > { %v1462_v14 = vmul.f32 1.442695, %v1459_v13 }
 0x410   : > { %2948 = vpow2.f32 %v1462_v14 }
 0x413   : > { %v1455_v15 = vpop.xlane.xlu2 %1454 }
 0x414   : > { %v1460_v16 = vsub.f32 %v1448_v55, %v1455_v15  ;;  %v2802_v55 = vld [vmem:[%s3287_s20 + $0x28] sm:$0xff]  ;;  %s3810_s20 = sld [smem:[#allocation28_spill]] (!%p2723_p1) }
 0x415   : > { %1557 = vmatpush.bf16.msrb.mxu2 %v2802_v55  ;;  %v2817_v55 = vld [vmem:[%s3311_s3 + $0x64] sm:$0xf] }
 0x416   : > { %v2949_v17 = vpop.eup %2948  ;;  %v1464_v18 = vmul.f32 1.442695, %v1460_v16  ;;  %v2932_v16 = vld [vmem:[%s3803_s1] ss:$0 sm:$0xff] }
 0x417   : > { %v1468_v19 = vsel %vm1335_vm13, %v2949_v17, 0.0 }
 0x418   : > { %2950 = vpow2.f32 %v1464_v18  ;;  %1469 = vadd.xlane.f32.xlu1 %v1468_v19 }
 0x419   : > { %1558 = vmatpush.bf16.msrb.mxu2 %v2801_v56  ;;  %v2646_v56 = vor.u32 %v2818_v54, %v2645_v53 }
 0x41b   : > { %v1345_v20 = vpop.xlane.xlu2 %1344 }
 0x41c   : > { %v1348_v21 = vsub.f32 %v1334_v60, %v1345_v20 }
 0x41e   : > { %v2951_v22 = vpop.eup %2950  ;;  %v1353_v23 = vmul.f32 1.442695, %v1348_v21  ;;  %v1485_v24 = vpop.permute.xlu0 %1484 }
 0x41f   : > { %1505 = vmatpush.bf16.msrb.mxu1 %v1485_v24  ;;  %v1471_v25 = vsel %vm1335_vm13, %v2951_v22, 0.0  ;;  %v1480_v26 = vpack.c.bf16 %v2951_v22, %v2949_v17 }
 0x420   : > { %2952 = vpow2.f32 %v1353_v23  ;;  %1472 = vadd.xlane.f32.xlu2 %v1471_v25 }
 0x422   : > { %2557 = vmatmul.msk.bf16.vlgmr.msrb.gmra.mxu1 %vm1335_vm13, %v1480_v26 }
 0x423   : > { %v1458_v28 = vpop.xlane.xlu2 %1457 }
 0x424   : > { %v1461_v29 = vsub.f32 %v1449_v3, %v1458_v28 }
 0x426   : > { %v2953_v30 = vpop.eup %2952  ;;  %v1466_v31 = vmul.f32 1.442695, %v1461_v29 }
 0x427   : > { %v1361_v32 = vsel %vm1342_vm14, %v2953_v30, 0.0  ;;  %v1368_v33 = vpack.c.bf16 %v2953_v30, %v2953_v30 }
 0x428   : > { %2954 = vpow2.f32 %v1466_v31  ;;  %1362 = vadd.xlane.f32.xlu2 %v1361_v32 }
 0x429   : > { %2554 = vmatmul.msk.bf16.gmra.mxu3 %vm1335_vm13, %v1368_v33 }
 0x42b   : > { %v1357_v43 = vpop.xlane.xlu2 %1356 }
 0x42c   : > { %2956 = vrcp.f32 %v1357_v43 }
 0x42e   : > { %v2955_v36 = vpop.eup %2954 }
 0x42f   : > { %v1474_v37 = vsel %vm1342_vm14, %v2955_v36, 0.0  ;;  %v1481_v38 = vpack.c.bf16 %v2955_v36, %v2955_v36 }
 0x430   : > { %1475 = vadd.xlane.f32.xlu2 %v1474_v37 }
 0x432   : > { %2558 = vmatmul.msk.bf16.gmra.mxu1 %vm1335_vm13, %v1481_v38  ;;  %v2957_v46 = vpop.eup %2956 }
 0x437   : > { %v1391_v44 = vpop.f32.mrf.mxu3 }
 0x438   : > { %v1400_v48 = vmul.f32 %v2957_v46, %v1391_v44  ;;  %v2653_v46 = vld [vmem:[%s3311_s3 + $0x70] sm:$0xf] }
 0x43f   : > { %v1393_v52 = vpop.f32.mrf.mxu3 }
 0x449   : > { %v1360_v45 = vpop.xlane.xlu0 %1359 }
 0x44a   : > { %2958 = vrcp.f32 %v1360_v45 }
 0x450   : > { %v2959_v47 = vpop.eup %2958 }
 0x451   : > { %v1401_v50 = vmul.f32 %v2959_v47, %v1393_v52  ;;  %v2820_v47 = vld [vmem:[%s3311_s3 + $0x74] sm:$0xf0]  ;;  %v2819_v52 = vld [vmem:[%s3311_s3 + $0x74] sm:$0xf] }
 0x453   : > { %v1403_v51 = vpack.c.bf16 %v1401_v50, %v1400_v48  ;;  %v2654_v48 = vor.u32 %v2820_v47, %v2653_v46  ;;  %v2655_v50 = vld [vmem:[%s3311_s3 + $0x78] sm:$0xf0] }
 0x455   : > { %2593 = vmatmul.msk.bf16.vlgmr.msra.gmra.mxu3 %vm1301_vm12, %v1403_v51  ;;  %v2658_v51 = vor.u32 %v2819_v52, %v2655_v50  ;;  %1807 = vmatpush.bf16.msra.mxu0 %v2654_v48 }
 0x457   : > { %1825 = vmatpush.bf16.msra.mxu1 %v2658_v51 }
 0x459   : > { %1808 = vmatpush.bf16.msra.mxu0 %v2646_v56 }
 0x48b   : > { %v1470_v57 = vpop.xlane.xlu1 %1469 }
 0x48c   : > { %2960 = vrcp.f32 %v1470_v57 }
 0x492   : > { %v2961_v62 = vpop.eup %2960 }
 0x493   : > { %v1473_v58 = vpop.xlane.xlu2 %1472 }
 0x494   : > { %2962 = vrcp.f32 %v1473_v58  ;;  %v2647_v58 = vld [vmem:[%s3311_s3 + $0x68] sm:$0xf0] }
 0x495   : > { %v2650_v57 = vor.u32 %v2817_v55, %v2647_v58 }
 0x497   : > { %1826 = vmatpush.bf16.msra.mxu1 %v2650_v57 }
 0x49a   : > { %v2963_v63 = vpop.eup %2962 }
 0x49b   : > { %v1363_v61 = vpop.xlane.xlu2 %1362 }
 0x49c   : > { %2964 = vrcp.f32 %v1363_v61  ;;  %v2816_v61 = vld [vmem:[%s3311_s3 + $0x54] sm:$0xf0] }
 0x49f   : > { %v1507_v60 = vpop.f32.mrf.mxu1 }
 0x4a0   : > { %v1516_v1 = vmul.f32 %v2961_v62, %v1507_v60  ;;  %v2637_v60 = vld [vmem:[%s3311_s3 + $0x50] sm:$0xf]  ;;  %v2815_v62 = vld [vmem:[%s3311_s3 + $0x54] sm:$0xf] }
 0x4a2   : > { %v2965_v4 = vpop.eup %2964 }
 0x4a3   : > { %v1476_v5 = vpop.xlane.xlu2 %1475 }
 0x4a4   : > { %2966 = vrcp.f32 %v1476_v5 }
 0x4a7   : > { %v1509_v0 = vpop.f32.mrf.mxu1 }
 0x4a8   : > { %v1517_v2 = vmul.f32 %v2963_v63, %v1509_v0  ;;  %v2638_v63 = vor.u32 %v2816_v61, %v2637_v60  ;;  %v2639_v0 = vld [vmem:[%s3311_s3 + $0x58] sm:$0xf0]  ;;  %v2933_v61 = vld [vmem:[%s3804_s5] ss:$0 sm:$0xff] }
 0x4aa   : > { %v1519_v3 = vpack.c.bf16 %v1517_v2, %v1516_v1  ;;  %v2967_v59 = vpop.eup %2966  ;;  %v2642_v1 = vor.u32 %v2815_v62, %v2639_v0  ;;  %1809 = vmatpush.bf16.msra.mxu0 %v2638_v63  ;;  %v2629_v2 = vld [vmem:[%s3311_s3 + $0x40] sm:$0xf] }
 0x4ac   : > { %v1396_v6 = vpop.f32.mrf.mxu3  ;;  %2575 = vmatmul.msk.bf16.vlgmr.msrb.gmra.mxu2 %vm1301_vm12, %v1519_v3  ;;  %1827 = vmatpush.bf16.msra.mxu1 %v2642_v1  ;;  %v2814_v3 = vld [vmem:[%s3311_s3 + $0x44] sm:$0xf0] }
 0x4ad   : > { %v1402_v7 = vmul.f32 %v2965_v4, %v1396_v6  ;;  %v2813_v4 = vld [vmem:[%s3311_s3 + $0x44] sm:$0xf]  ;;  %v2630_v5 = vor.u32 %v2814_v3, %v2629_v2  ;;  %v2631_v6 = vld [vmem:[%s3311_s3 + $0x48] sm:$0xf0] }
 0x4af   : > { %v1404_v8 = vpack.c.bf16 %v1402_v7, %v1402_v7  ;;  %v1512_v9 = vpop.f32.mrf.mxu1  ;;  %v2634_v7 = vor.u32 %v2813_v4, %v2631_v6  ;;  %1810 = vmatpush.bf16.msra.mxu0 %v2630_v5  ;;  %v2934_v4 = vld [vmem:[%s3805_s6] ss:$0 sm:$0xff] }
 0x4b0   : > { %v1518_v11 = vmul.f32 %v2967_v59, %v1512_v9  ;;  %v2812_v9 = vld [vmem:[%s3311_s3 + $0x34] sm:$0xf0] }
 0x4b1   : > { %2594 = vmatmul.msk.bf16.gmra.mxu3 %vm1301_vm12, %v1404_v8  ;;  %1828 = vmatpush.bf16.msra.mxu1 %v2634_v7  ;;  %v2621_v8 = vld [vmem:[%s3311_s3 + $0x30] sm:$0xf] }
 0x4b2   : > { %v1520_v13 = vpack.c.bf16 %v1518_v11, %v1518_v11  ;;  %v2622_v59 = vor.u32 %v2812_v9, %v2621_v8  ;;  %v2623_v11 = vld [vmem:[%s3311_s3 + $0x38] sm:$0xf0] }
 0x4b4   : > { %v1398_v10 = vpop.f32.mrf.mxu3  ;;  %1811 = vmatpush.bf16.msra.mxu0 %v2622_v59 }
 0x4b5   : > { %v2811_v10 = vld [vmem:[%s3311_s3 + $0x34] sm:$0xf] }
 0x4b7   : > { %v1514_v12 = vpop.f32.mrf.mxu1 }
 0x4b8   : > { %v2626_v12 = vor.u32 %v2811_v10, %v2623_v11 }
 0x4ba   : > { %1829 = vmatpush.bf16.msra.mxu1 %v2626_v12 }
 0x4bc   : > { %2576 = vmatmul.msk.bf16.gmra.mxu2 %vm1301_vm12, %v1520_v13  ;;  %v2613_v13 = vld [vmem:[%s3311_s3 + $0x20] sm:$0xf] }
 0x4d8   : > { %v1608_v14 = vpop.f32.mrf.mxu3 }
 0x4e0   : > { %v1610_v15 = vpop.f32.mrf.mxu3 }
 0x52f   : > { %v1560_v17 = vpop.f32.mrf.mxu2 }
 0x530   : > { %v1609_v18 = vadd.f32 %v1608_v14, %v1560_v17  ;;  %v2810_v14 = vld [vmem:[%s3311_s3 + $0x24] sm:$0xf0]  ;;  %v2615_v17 = vld [vmem:[%s3311_s3 + $0x28] sm:$0xf0] }
 0x532   : > { %v1621_v19 = vadd.f32 %v2932_v16, %v1609_v18 }
 0x534   : > { %v1613_v20 = vpop.f32.mrf.mxu3  ;;  %v3534_v21 = vadd.f32 %v1621_v19, %v3385_v39  ;;  %v2605_v19 = vld [vmem:[%s3311_s3 + $0x10] sm:$0xf] }
 0x536   : > { %1629 = vadd.xlane.f32.xlu2 %v3534_v21 }
 0x537   : > { %v1562_v22 = vpop.f32.mrf.mxu2 }
 0x538   : > { %v1611_v23 = vadd.f32 %v1610_v15, %v1562_v22  ;;  %v2809_v15 = vld [vmem:[%s3311_s3 + $0x24] sm:$0xf]  ;;  %v2807_v22 = vld [vmem:[%s3311_s3 + $0x14] sm:$0xf] }
 0x539   : > { %v2618_v18 = vor.u32 %v2809_v15, %v2615_v17  ;;  %v2828_v15 = vld [vmem:[%s3321_s28 + $0x38] sm:$0xff]  ;;  %v2827_v17 = vld [vmem:[%s3321_s28 + $0x30] sm:$0xff] }
 0x53a   : > { %v1622_v24 = vadd.f32 %v2932_v16, %v1611_v23  ;;  %2033 = vmatpush.bf16.msra.mxu2 %v2828_v15 }
 0x53b   : > { %1830 = vmatpush.bf16.msra.mxu1 %v2618_v18  ;;  %v2835_v18 = vld [vmem:[%s3321_s28 + $0x70] sm:$0xff] }
 0x53c   : > { %v1615_v25 = vpop.f32.mrf.mxu3  ;;  %v3538_v26 = vadd.f32 %v1622_v24, %v3392_v42  ;;  %v2607_v24 = vld [vmem:[%s3311_s3 + $0x18] sm:$0xf0] }
 0x53e   : > { %1631 = vadd.xlane.f32.xlu2 %v3538_v26  ;;  %2034 = vmatpush.bf16.msra.mxu2 %v2827_v17 }
 0x53f   : > { %v1565_v27 = vpop.f32.mrf.mxu2 }
 0x540   : > { %v1614_v28 = vadd.f32 %v1613_v20, %v1565_v27  ;;  %v2808_v20 = vld [vmem:[%s3311_s3 + $0x14] sm:$0xf0]  ;;  %v2610_v27 = vor.u32 %v2807_v22, %v2607_v24  ;;  %v2833_v22 = vld [vmem:[%s3321_s28 + $0x60] sm:$0xff] }
 0x541   : > { %v2606_v23 = vor.u32 %v2808_v20, %v2605_v19  ;;  %v2834_v19 = vld [vmem:[%s3321_s28 + $0x68] sm:$0xff]  ;;  %v2825_v20 = vld [vmem:[%s3321_s28 + $0x20] sm:$0xff]  ;;  %v2832_v24 = vld [vmem:[%s3321_s28 + $0x58] sm:$0xff] }
 0x542   : > { %v1623_v29 = vadd.f32 %v2932_v16, %v1614_v28  ;;  %v2614_v16 = vor.u32 %v2810_v14, %v2613_v13  ;;  %1831 = vmatpush.bf16.msra.mxu1 %v2610_v27  ;;  %v2831_v27 = vld [vmem:[%s3321_s28 + $0x50] sm:$0xff] }
 0x544   : > { %v3542_v30 = vadd.f32 %v1623_v29, %v3387_v40  ;;  %1812 = vmatpush.bf16.msra.mxu0 %v2614_v16  ;;  %v2597_v29 = vld [vmem:[%s3311_s3] sm:$0xf]  ;;  %v2836_v16 = vld [vmem:[%s3321_s28 + $0x78] sm:$0xff] }
 0x545   : > { %2051 = vmatpush.bf16.msrb.mxu3 %v2836_v16 }
 0x546   : > { %v1633_v39 = vsel %vm979_vm1, %v3542_v30, 0.0 }
 0x547   : > { %1634 = vadd.xlane.f32.xlu0 %v1633_v39  ;;  %v1567_v31 = vpop.f32.mrf.mxu2  ;;  %v2806_v39 = vld [vmem:[%s3311_s3 + $0x4] sm:$0xf0] }
 0x548   : > { %1813 = vmatpush.bf16.msra.mxu0 %v2606_v23  ;;  %v2805_v31 = vld [vmem:[%s3311_s3 + $0x4] sm:$0xf]  ;;  %v2824_v23 = vld [vmem:[%s3321_s28 + $0x18] sm:$0xff] }
 0x549   : > { %2052 = vmatpush.bf16.msrb.mxu3 %v2835_v18 }
 0x54d   : > { %2053 = vmatpush.bf16.msrb.mxu3 %v2834_v19 }
 0x551   : > { %2054 = vmatpush.bf16.msrb.mxu3 %v2833_v22 }
 0x555   : > { %2055 = vmatpush.bf16.msrb.mxu3 %v2832_v24 }
 0x559   : > { %2056 = vmatpush.bf16.msrb.mxu3 %v2831_v27 }
 0x5a9   : > { %v1630_v32 = vpop.xlane.xlu2 %1629 }
 0x5aa   : > { %v1636_v33 = vmul.f32 %v1630_v32, %v3395_v49 }
 0x5ac   : > { %v3548_v42 = vsub.f32 %v3534_v21, %v1636_v33  ;;  %v2598_v33 = vor.u32 %v2806_v39, %v2597_v29  ;;  %v2822_v29 = vld [vmem:[%s3321_s28 + $0x8] sm:$0xff] }
 0x5ad   : > { %v2830_v39 = vld [vmem:[%s3321_s28 + $0x48] sm:$0xff] }
 0x5ae   : > { %v1642_v34 = vmul.f32 %v3548_v42, %v3548_v42  ;;  %1814 = vmatpush.bf16.msra.mxu0 %v2598_v33  ;;  %2057 = vmatpush.bf16.msrb.mxu3 %v2830_v39 }
 0x5b0   : > { %1645 = vadd.xlane.f32.xlu1 %v1642_v34  ;;  %v2599_v34 = vld [vmem:[%s3311_s3 + $0x8] sm:$0xf0] }
 0x5b1   : > { %v1632_v40 = vpop.xlane.xlu2 %1631 }
 0x5b2   : > { %v1637_v35 = vmul.f32 %v1632_v40, %v3395_v49  ;;  %v2602_v40 = vor.u32 %v2805_v31, %v2599_v34 }
 0x5b4   : > { %v3554_v36 = vsub.f32 %v3538_v26, %v1637_v35  ;;  %1832 = vmatpush.bf16.msra.mxu1 %v2602_v40  ;;  %v2821_v40 = vld [vmem:[%s3321_s28] sm:$0xff] }
 0x5b6   : > { %v1643_v37 = vmul.f32 %v3554_v36, %v3554_v36 }
 0x5b8   : > { %1647 = vadd.xlane.f32.xlu2 %v1643_v37 }
 0x5ba   : > { %v1635_v38 = vpop.xlane.xlu0 %1634 }
 0x5bb   : > { %v1638_v41 = vmul.f32 %v1635_v38, %v3395_v49 }
 0x5bd   : > { %v3560_v43 = vsub.f32 %v3542_v30, %v1638_v41 }
 0x5bf   : > { %v1644_v44 = vmul.f32 %v3560_v43, %v3560_v43 }
 0x5c1   : > { %v1649_v45 = vsel %vm979_vm1, %v1644_v44, 0.0 }
 0x5c2   : > { %1650 = vadd.xlane.f32.xlu0 %v1649_v45 }
 0x623   : > { %v1646_v25 = vpop.xlane.xlu1 %1645 }
 0x624   : > { %v1652_v28 = vmul.f32 %v1646_v25, %v3395_v49  ;;  %v2823_v25 = vld [vmem:[%s3321_s28 + $0x10] sm:$0xff] }
 0x626   : > { %v1655_v32 = vadd.f32 1e-12, %v1652_v28  ;;  %v1721_v28 = vld [vmem:[%s3316_s19] sm:$0x3] }
 0x627   : > { %v1723_v31 = vperm.slane %v1721_v28, 0 }
 0x628   : > { %2968 = vrsqrt.f32 %v1655_v32  ;;  %vm1664_vm0 = vweird.f32 %v1655_v32 }
 0x62b   : > { %v1648_v35 = vpop.xlane.xlu2 %1647 }
 0x62c   : > { %v1653_v37 = vmul.f32 %v1648_v35, %v3395_v49  ;;  %v2829_v35 = vld [vmem:[%s3321_s28 + $0x40] sm:$0xff] }
 0x62d   : > { %2058 = vmatpush.bf16.msrb.mxu3 %v2829_v35 }
 0x62e   : > { %v2969_v38 = vpop.eup %2968  ;;  %v1656_v41 = vadd.f32 1e-12, %v1653_v37 }
 0x62f   : > { %v1659_v44 = vmul.f32 %v2969_v38, %v1655_v32  ;;  %vm1665_vm15 = vweird.f32 %v2969_v38  ;;  %v1724_v32 = vperm.slane %v1721_v28, 1 }
 0x630   : > { %2970 = vrsqrt.f32 %v1656_v41  ;;  %vm1666_vm2 = vmor %vm1664_vm0, %vm1665_vm15  ;;  %vm1674_vm4 = vweird.f32 %v1656_v41 }
 0x631   : > { %v1660_v45 = vmul.f32 %v2969_v38, %v1659_v44 }
 0x633   : > { %v1661_v46 = vmul.f32 0.5, %v1660_v45 }
 0x635   : > { %v1662_v47 = vsub.f32 1.5, %v1661_v46  ;;  %v1651_v52 = vpop.xlane.xlu0 %1650 }
 0x636   : > { %v2971_v48 = vpop.eup %2970  ;;  %v1654_v50 = vmul.f32 %v1651_v52, %v3395_v49 }
 0x637   : > { %v1663_v51 = vmul.f32 %v2969_v38, %v1662_v47  ;;  %v1669_v53 = vmul.f32 %v2971_v48, %v1656_v41  ;;  %vm1675_vm3 = vweird.f32 %v2971_v48 }
 0x638   : > { %v1657_v54 = vadd.f32 1e-12, %v1654_v50  ;;  %vm1676_vm5 = vmor %vm1674_vm4, %vm1675_vm3 }
 0x639   : > { %v1670_v55 = vmul.f32 %v2971_v48, %v1669_v53  ;;  %v1667_v56 = vsel %vm1666_vm2, %v2969_v38, %v1663_v51 }
 0x63a   : > { %2972 = vrsqrt.f32 %v1657_v54  ;;  %v1688_v60 = vmul.f32 %v1667_v56, %v3548_v42  ;;  %vm1684_vm7 = vweird.f32 %v1657_v54 }
 0x63b   : > { %v1671_v58 = vmul.f32 0.5, %v1670_v55 }
 0x63c   : > { %v1694_v3 = vmul.f32 %v2933_v61, %v1688_v60 }
 0x63d   : > { %v1672_v57 = vsub.f32 1.5, %v1671_v58 }
 0x63e   : > { %v1700_v7 = vadd.f32 %v2934_v4, %v1694_v3 }
 0x63f   : > { %v1673_v62 = vmul.f32 %v2971_v48, %v1672_v57 }
 0x640   : > { %v2973_v63 = vpop.eup %2972 }
 0x641   : > { %v1677_v0 = vsel %vm1676_vm5, %v2971_v48, %v1673_v62  ;;  %v1679_v1 = vmul.f32 %v2973_v63, %v1657_v54  ;;  %vm1685_vm6 = vweird.f32 %v2973_v63 }
 0x642   : > { %v1689_v2 = vmul.f32 %v1677_v0, %v3554_v36  ;;  %vm1686_vm8 = vmor %vm1684_vm7, %vm1685_vm6 }
 0x643   : > { %v1680_v42 = vmul.f32 %v2973_v63, %v1679_v1 }
 0x644   : > { %v1695_v5 = vmul.f32 %v2933_v61, %v1689_v2 }
 0x645   : > { %v1681_v6 = vmul.f32 0.5, %v1680_v42 }
 0x646   : > { %v1701_v8 = vadd.f32 %v2934_v4, %v1695_v5 }
 0x647   : > { %v1682_v9 = vsub.f32 1.5, %v1681_v6 }
 0x648   : > { %v1703_v10 = vpack.c.bf16 %v1701_v8, %v1700_v7 }
 0x649   : > { %v1683_v59 = vmul.f32 %v2973_v63, %v1682_v9 }
 0x64a   : > { %1815 = vmatmul.bf16.vlgmr.msra.gmra.mxu0 %v1703_v10  ;;  %1833 = vmatmul.bf16.vlgmr.msra.gmra.mxu1 %v1703_v10 }
 0x64b   : > { %v1687_v36 = vsel %vm1686_vm8, %v2973_v63, %v1683_v59 }
 0x64c   : > { %v1690_v11 = vmul.f32 %v1687_v36, %v3560_v43  ;;  %v2826_v43 = vld [vmem:[%s3321_s28 + $0x28] sm:$0xff] }
 0x64d   : > { %2035 = vmatpush.bf16.msra.mxu2 %v2826_v43 }
 0x64e   : > { %v1696_v12 = vmul.f32 %v2933_v61, %v1690_v11 }
 0x650   : > { %v1702_v13 = vadd.f32 %v2934_v4, %v1696_v12 }
 0x651   : > { %2036 = vmatpush.bf16.msra.mxu2 %v2825_v20 }
 0x652   : > { %v1704_v14 = vpack.c.bf16 %v1702_v13, %v1702_v13 }
 0x655   : > { %2037 = vmatpush.bf16.msra.mxu2 %v2824_v23 }
 0x659   : > { %2038 = vmatpush.bf16.msra.mxu2 %v2823_v25 }
 0x65a   : > { %1820 = vmatmul.bf16.gmra.mxu0 %v1704_v14  ;;  %1838 = vmatmul.bf16.gmra.mxu1 %v1704_v14 }
 0x65d   : > { %2039 = vmatpush.bf16.msra.mxu2 %v2822_v29 }
 0x661   : > { %2040 = vmatpush.bf16.msra.mxu2 %v2821_v40 }
 0x6c7   : > { %v1816_v33 = vpop.f32.mrf.mxu0  ;;  %v1834_v34 = vpop.f32.mrf.mxu1 }
 0x6c8   : > { %v1817_v37 = vadd.f32 %v1816_v33, %v1723_v31  ;;  %v3630_v38 = vadd.f32 %v1834_v34, %v1724_v32 }
 0x6ca   : > { %v1843_v41 = vmul.f32 %v1817_v37, %v1817_v37  ;;  %v1844_v44 = vmul.f32 %v3630_v38, %v3630_v38 }
 0x6cc   : > { %v1849_v45 = vmul.f32 %v1843_v41, %v1817_v37  ;;  %v1850_v46 = vmul.f32 %v1844_v44, %v3630_v38 }
 0x6ce   : > { %v1855_v47 = vmul.f32 0.044715, %v1849_v45  ;;  %v1856_v52 = vmul.f32 0.044715, %v1850_v46 }
 0x6cf   : > { %v1818_v48 = vpop.f32.mrf.mxu0  ;;  %v1836_v50 = vpop.f32.mrf.mxu1 }
 0x6d0   : > { %v1861_v51 = vadd.f32 %v1855_v47, %v1817_v37  ;;  %v1862_v53 = vadd.f32 %v1856_v52, %v3630_v38  ;;  %v1819_v54 = vadd.f32 %v1818_v48, %v1723_v31  ;;  %v1837_v55 = vadd.f32 %v1836_v50, %v1724_v32 }
 0x6d2   : > { %v1867_v56 = vmul.f32 0.7978846, %v1861_v51  ;;  %v1845_v58 = vmul.f32 %v1819_v54, %v1819_v54  ;;  %v1846_v57 = vmul.f32 %v1837_v55, %v1837_v55  ;;  %v1868_v60 = vmul.f32 0.7978846, %v1862_v53 }
 0x6d4   : > { %v1851_v61 = vmul.f32 %v1845_v58, %v1819_v54  ;;  %v1852_v62 = vmul.f32 %v1846_v57, %v1837_v55  ;;  %2974 = vtanh.f32 %v1867_v56 }
 0x6d5   : > { %2976 = vtanh.f32 %v1868_v60 }
 0x6d6   : > { %v1857_v63 = vmul.f32 0.044715, %v1851_v61  ;;  %v1858_v0 = vmul.f32 0.044715, %v1852_v62 }
 0x6d7   : > { %v1821_v1 = vpop.f32.mrf.mxu0  ;;  %v1839_v2 = vpop.f32.mrf.mxu1 }
 0x6d8   : > { %v1863_v3 = vadd.f32 %v1857_v63, %v1819_v54  ;;  %v1864_v4 = vadd.f32 %v1858_v0, %v1837_v55  ;;  %v1822_v42 = vadd.f32 %v1821_v1, %v1723_v31  ;;  %v1840_v5 = vadd.f32 %v1839_v2, %v1724_v32 }
 0x6da   : > { %v1869_v6 = vmul.f32 0.7978846, %v1863_v3  ;;  %v1870_v7 = vmul.f32 0.7978846, %v1864_v4  ;;  %v1847_v8 = vmul.f32 %v1822_v42, %v1822_v42  ;;  %v1848_v9 = vmul.f32 %v1840_v5, %v1840_v5  ;;  %v2975_v10 = vpop.eup %2974 }
 0x6db   : > { %v2977_v11 = vpop.eup %2976  ;;  %v1879_v14 = vadd.f32 1.0, %v2975_v10 }
 0x6dc   : > { %2978 = vtanh.f32 %v1869_v6  ;;  %v1853_v59 = vmul.f32 %v1847_v8, %v1822_v42  ;;  %v1854_v36 = vmul.f32 %v1848_v9, %v1840_v5  ;;  %v1880_v17 = vadd.f32 1.0, %v2977_v11 }
 0x6dd   : > { %2980 = vtanh.f32 %v1870_v7  ;;  %v1885_v24 = vmul.f32 0.5, %v1879_v14 }
 0x6de   : > { %v1859_v12 = vmul.f32 0.044715, %v1853_v59  ;;  %v1860_v13 = vmul.f32 0.044715, %v1854_v36  ;;  %v1886_v27 = vmul.f32 0.5, %v1880_v17 }
 0x6df   : > { %v1823_v15 = vpop.f32.mrf.mxu0  ;;  %v1841_v16 = vpop.f32.mrf.mxu1  ;;  %v1891_v31 = vmul.f32 %v1885_v24, %v1817_v37  ;;  %v2935_v37 = vld [vmem:[%s809_s22] ss:$0 sm:$0xff]  ;;  %s3808_s22 = sld [smem:[#allocation25_spill]] (!%p2723_p1) }
 0x6e0   : > { %v1865_v18 = vadd.f32 %v1859_v12, %v1822_v42  ;;  %v1866_v43 = vadd.f32 %v1860_v13, %v1840_v5  ;;  %v1892_v33 = vmul.f32 %v1886_v27, %v3630_v38 }
 0x6e2   : > { %v2979_v19 = vpop.eup %2978  ;;  %v1871_v20 = vmul.f32 0.7978846, %v1865_v18  ;;  %v1872_v22 = vmul.f32 0.7978846, %v1866_v43 }
 0x6e3   : > { %v2981_v23 = vpop.eup %2980  ;;  %v1881_v25 = vadd.f32 1.0, %v2979_v19 }
 0x6e4   : > { %v1882_v28 = vadd.f32 1.0, %v2981_v23  ;;  %2982 = vtanh.f32 %v1871_v20 }
 0x6e5   : > { %v1887_v29 = vmul.f32 0.5, %v1881_v25  ;;  %2984 = vtanh.f32 %v1872_v22 }
 0x6e6   : > { %v1888_v39 = vmul.f32 0.5, %v1882_v28 }
 0x6e7   : > { %v1893_v32 = vmul.f32 %v1887_v29, %v1819_v54 }
 0x6e8   : > { %v1894_v34 = vmul.f32 %v1888_v39, %v1837_v55 }
 0x6e9   : > { %v1897_v40 = vpack.c.bf16 %v1893_v32, %v1891_v31 }
 0x6ea   : > { %v2983_v35 = vpop.eup %2982  ;;  %v1898_v41 = vpack.c.bf16 %v1894_v34, %v1892_v33 }
 0x6eb   : > { %v2985_v44 = vpop.eup %2984  ;;  %2041 = vmatmul.bf16.vlgmr.msra.gmra.mxu2 %v1897_v40  ;;  %v1883_v45 = vadd.f32 1.0, %v2983_v35 }
 0x6ec   : > { %2059 = vmatmul.bf16.vlgmr.msrb.gmra.mxu3 %v1898_v41  ;;  %v1884_v46 = vadd.f32 1.0, %v2985_v44 }
 0x6ed   : > { %v1889_v47 = vmul.f32 0.5, %v1883_v45 }
 0x6ee   : > { %v1890_v52 = vmul.f32 0.5, %v1884_v46 }
 0x6ef   : > { %v1895_v48 = vmul.f32 %v1889_v47, %v1822_v42 }
 0x6f0   : > { %v1896_v50 = vmul.f32 %v1890_v52, %v1840_v5 }
 0x6f1   : > { %v1899_v51 = vpack.c.bf16 %v1895_v48, %v1895_v48 }
 0x6f2   : > { %v1900_v53 = vpack.c.bf16 %v1896_v50, %v1896_v50 }
 0x6fb   : > { %2046 = vmatmul.bf16.gmra.mxu2 %v1899_v51 }
 0x6fc   : > { %2064 = vmatmul.bf16.gmra.mxu3 %v1900_v53 }
 0x76e   : > { %v2042_v38 = vpop.f32.mrf.mxu2 }
 0x76f   : > { %v2043_v54 = vadd.f32 %v2935_v37, %v2042_v38  ;;  %v2060_v55 = vpop.f32.mrf.mxu3 }
 0x771   : > { %v2061_v56 = vadd.f32 %v2060_v55, %v2043_v54 }
 0x773   : > { %v2069_v58 = vadd.f32 %v2061_v56, %v3534_v21 }
 0x775   : > { %2072 = vst [vmem:[#allocation2 + $0x10] sm:$0xff] %v2069_v58 }
 0x776   : > { %v2044_v57 = vpop.f32.mrf.mxu2 }
 0x777   : > { %v2045_v60 = vadd.f32 %v2935_v37, %v2044_v57  ;;  %v2062_v61 = vpop.f32.mrf.mxu3 }
 0x779   : > { %v2063_v62 = vadd.f32 %v2062_v61, %v2045_v60 }
 0x77b   : > { %v2070_v63 = vadd.f32 %v2063_v62, %v3538_v26 }
 0x77d   : > { %2073 = vst [vmem:[#allocation2] sm:$0xff] %v2070_v63 }
 0x77e   : > { %v2047_v0 = vpop.f32.mrf.mxu2 }
 0x77f   : > { %v2048_v1 = vadd.f32 %v2935_v37, %v2047_v0  ;;  %v2065_v2 = vpop.f32.mrf.mxu3 }
 0x781   : > { %v2066_v3 = vadd.f32 %v2065_v2, %v2048_v1 }
 0x783   : > { %v2071_v4 = vadd.f32 %v2066_v3, %v3542_v30  ;;  %2078 = sbr.rel (%p2723_p1) target bundleno = 2332 (0x91c), region = 104 }
 0x785   : > { %2074 = vst [vmem:[#allocation2 + $0x8] sm:$0x1] %v2071_v4 }
 0x786   : > { %v2049_v42 = vpop.f32.mrf.mxu2 }
 0x787   : > { %v2067_v5 = vpop.f32.mrf.mxu3 }
 0x788   : > { %v2081_v21 = vsel %vm979_vm1, %v2069_v58, 0.0  ;;  %v2844_v26 = vld [vmem:[%s3807_s18 + $0x38] sm:$0xff]  ;;  %v2843_v10 = vld [vmem:[%s3807_s18 + $0x30] sm:$0xff]  ;;  %v2842_v59 = vld [vmem:[%s3807_s18 + $0x28] sm:$0xff] }
 0x789   : > { %2082 = vadd.xlane.f32.xlu0 %v2081_v21  ;;  %2171 = vmatpush.bf16.msra.mxu0 %v2844_v26  ;;  %v2841_v36 = vld [vmem:[%s3807_s18 + $0x20] sm:$0xff]  ;;  %v2840_v11 = vld [vmem:[%s3807_s18 + $0x18] sm:$0xff]  ;;  %v2839_v12 = vld [vmem:[%s3807_s18 + $0x10] sm:$0xff] }
 0x78a   : > { %v2838_v13 = vld [vmem:[%s3807_s18 + $0x8] sm:$0xff]  ;;  %v2837_v14 = vld [vmem:[%s3807_s18] sm:$0xff] }
 0x78b   : > { %v2079_v24 = vld [vmem:[%s3808_s22] sm:$0x1] }
 0x78c   : > { %v2122_v31 = vld [vmem:[%s3810_s20] sm:$0x1] }
 0x78d   : > { %2172 = vmatpush.bf16.msra.mxu0 %v2843_v10 }
 0x791   : > { %2173 = vmatpush.bf16.msra.mxu0 %v2842_v59 }
 0x795   : > { %2174 = vmatpush.bf16.msra.mxu0 %v2841_v36 }
 0x799   : > { %2175 = vmatpush.bf16.msra.mxu0 %v2840_v11 }
 0x79d   : > { %2176 = vmatpush.bf16.msra.mxu0 %v2839_v12 }
 0x7a1   : > { %2177 = vmatpush.bf16.msra.mxu0 %v2838_v13 }
 0x7a5   : > { %2178 = vmatpush.bf16.msra.mxu0 %v2837_v14 }
 0x7fc   : > { %v2083_v6 = vpop.xlane.xlu0 %2082 }
 0x7fd   : > { %v2084_v7 = vmul.f32 %v2083_v6, %v3395_v49 }
 0x7ff   : > { %v2085_v8 = vsub.f32 %v2069_v58, %v2084_v7 }
 0x801   : > { %v2086_v9 = vmul.f32 %v2085_v8, %v2085_v8 }
 0x803   : > { %v2087_v30 = vsel %vm979_vm1, %v2086_v9, 0.0 }
 0x804   : > { %2088 = vadd.xlane.f32.xlu0 %v2087_v30 }
 0x877   : > { %v2089_v15 = vpop.xlane.xlu0 %2088 }
 0x878   : > { %v2090_v16 = vmul.f32 %v2089_v15, %v3395_v49  ;;  %v2080_v49 = vld [vmem:[%s3809_s26] sm:$0x1] }
 0x87a   : > { %v2091_v17 = vadd.f32 1e-12, %v2090_v16 }
 0x87c   : > { %2986 = vrsqrt.f32 %v2091_v17  ;;  %vm2098_vm9 = vweird.f32 %v2091_v17 }
 0x882   : > { %v2987_v18 = vpop.eup %2986 }
 0x883   : > { %v2093_v43 = vmul.f32 %v2987_v18, %v2091_v17  ;;  %vm2099_vm1 = vweird.f32 %v2987_v18 }
 0x884   : > { %vm2100_vm10 = vmor %vm2098_vm9, %vm2099_vm1 }
 0x885   : > { %v2094_v19 = vmul.f32 %v2987_v18, %v2093_v43 }
 0x887   : > { %v2095_v20 = vmul.f32 0.5, %v2094_v19 }
 0x889   : > { %v2096_v22 = vsub.f32 1.5, %v2095_v20 }
 0x88b   : > { %v2097_v23 = vmul.f32 %v2987_v18, %v2096_v22 }
 0x88d   : > { %v2101_v25 = vsel %vm2100_vm10, %v2987_v18, %v2097_v23 }
 0x88e   : > { %v2102_v27 = vmul.f32 %v2101_v25, %v2085_v8 }
 0x890   : > { %v2103_v28 = vmul.f32 %v2102_v27, %v2079_v24 }
 0x892   : > { %v2104_v29 = vadd.f32 %v2103_v28, %v2080_v49 }
 0x894   : > { %v2105_v39 = vpack.c.bf16 %v2104_v29, %v2104_v29 }
 0x896   : > { %2179 = vmatmul.bf16.vlgmr.msra.gmra.mxu0 %v2105_v39 }
 0x913   : > { %v2180_v32 = vpop.f32.mrf.mxu0 }
 0x914   : > { %v2181_v33 = vadd.f32 %v2180_v32, %v2122_v31 }
 0x916   : > { %2184 = vst [vmem:[%s3329_s17] sm:$0x1] %v2181_v33 }
 0x91b   : > { %v2182_v34 = vpop.f32.mrf.mxu0 }
 0x91c PF: > { %s3811_s23 = sld [smem:[#allocation9_spill]]  ;;  %s2196_s6 = sshll.u32 %s3329_s17, 4  ;;  %s2197_s6 = int_to_ptr.vmem [resolvable:$true] %s2196_s6 }
 0x91d   : > { %s3812_s2 = sld [smem:[#allocation29_spill]]  ;;  %s3815_s28 = sand.u32 1, %s3058_s30  }
 0x91e   : > { %s2186_s0 = scalar_lea.sflag [#allocation4], %s3815_s28 }
 0x923   : > { %s3813_s5 = smov %s3812_s2  ;;  %s2194_s21 = scalar_lea.hbm %s3812_s2, %s3811_s23 }
 0x924   : > { %s2198_s19 = sshll.u32 %s2194_s21, 4  ;;  %s3008_s15 = scalar_lea.hbm %s3813_s5, 2  ;;  %s2199_s19 = int_to_ptr.hbm [resolvable:$true] %s2198_s19 }
 0x925   : > { %s3002_s22 = sshra.s32 %s2199_s19, 4  ;;  %s3003_s22 = int_to_ptr.hbm [resolvable:$true] %s3002_s22 }
 0x926   : > { %s3004_s25 = scalar_lea.hbm %s3003_s22, 1  ;;  %p3009_p6 = scmp.lt.s32.totalorder %s3003_s22, %s3813_s5 }
 0x927   : > { %p3005_p2 = scmp.ne.s32.totalorder %s3003_s22, %s3004_s25  ;;  %p3010_p7 = scmp.lt.s32.totalorder %s3008_s15, %s3004_s25 }
 0x929   : > { %p3006_p4 = pnand %p3005_p2, %p3236_p3  ;;  %p3011_p8 = por %p3010_p7, %p3009_p6 }
 0x92b   : > { %p3007_p5 = pneg %p3006_p4 }
 0x92d   : > { %p3012_p10 = pnand %p3011_p8, %p3007_p5 }
 0x92f   : > { %3015 = shalt.err (!%p3012_p10)
}
 0x930   : > { %2856 = dma.vmem_to_hbm [thread:$0]  (%p3236_p3), %s2197_s6, 16, %s2199_s19, %s2186_s0  }
 0x931 PF: > { %s3816_s17 = sld [smem:[#allocation12_spill]] }
 0x932   : > { %s3817_s23 = sld [smem:[#allocation6_spill]] }
 0x937   : > { %p2862_p11 = scmp.ge.s32.totalorder %s3816_s17, 2 }
 0x938   : > { %s2210_s3 = sand.u32 1, %s3817_s23  }
 0x939   : > { %p2859_p12 = pnand %p2862_p11, %p3246_p9  ;;  %s2211_s2 = scalar_lea.sflag [#allocation4], %s2210_s3 }
 0x93b   : > { %p2860_p13 = pneg %p2859_p12 }
 0x93d   : > { %3049 = dma.done.wait (%p2860_p13), %s2211_s2, 16  }
 0x93e   : > { %3051 = vsyncadd (%p2860_p13), %s2211_s2, 4294967280  ;;  %s32_s23 = sadd.s32 1, %s3816_s17   ;;  %s3819_s21 = sld [smem:[#allocation7_spill]] }
 0x93f   : > { %p29_p0 = scmp.ge.s32.totalorder %s32_s23, 6   ;;  %s3820_s20 = sld [smem:[#allocation17_spill]] }
 0x940   : > { %s3821_s27 = sld [smem:[#allocation10_spill]]  ;;  %s3825_s0 = smov %s3058_s30 }
 0x941   : > { %s3822_s1 = sld [smem:[#allocation11_spill]] }
 0x942   : > { %s3823_s22 = sld [smem:[#allocation13_spill]]  ;;  %31 = sbr.rel (!%p29_p0) target bundleno = 18 (0x12), region = 175 }
 0x943   : > { %s3824_s2 = sld [smem:[#allocation15_spill]] }
 0x944   : > { %s3826_s30 = smov %s3819_s21 }
 0x946   : > { %s3827_s21 = smov %s3821_s27 }
 0x947   :  { %2216 = vsyncpa [#allocation4], 1 }
 0x948   :  { %2218 = vsyncpa [#allocation4 + $0x1], 1 }

</bundles_post_ra>
